<compile_context>
chip_gen: v6e
topology: v6e:2x2x1
jax: 0.10.0
libtpu: 0.0.40
codegen_flags: <defaults>
</compile_context>

<pallas_src>
import functools
import math

import jax
import jax.numpy as jnp
from jax.experimental import pallas as pl
from jax.experimental.pallas import tpu as pltpu


# -----------------------------------------------------------------------------
# In-kernel helpers
# -----------------------------------------------------------------------------
def _leaky_relu(x, alpha):
    return jnp.where(x > 0.0, x, alpha * x)


def _elu(x):
    # ELU(x) = x if x > 0 else exp(x) - 1 ; min() keeps exp() in range on the dead branch.
    return jnp.where(x > 0.0, x, jnp.exp(jnp.minimum(x, 0.0)) - 1.0)


def _head_attention(wh, wh1_col, wh2_row, bias_ref, *, alpha, exp_dtype):
    """One attention head: (masked softmax(leakyrelu(wh1 + wh2^T))) @ Wh.

    wh:       [N, F] f32   projected features for this head
    wh1_col:  [N, 1] f32   query scores (Wh @ a1)
    wh2_row:  [1, N] f32   key scores   (Wh @ a2), already lane-major
    bias_ref: [N, N] bf16  additive adjacency mask (0 / -9e15)
    """
    e = _leaky_relu(wh1_col + wh2_row, alpha)                    # [N, N] f32
    logits = e + bias_ref[...]                                   # bf16 mask promoted per element
    logits = logits - jnp.max(logits, axis=1, keepdims=True)
    p = jnp.exp(logits.astype(exp_dtype))                        # EUP (bf16 on v6e/v7x)
    denom = jnp.sum(p, axis=1, keepdims=True, dtype=jnp.float32)
    inv = pl.reciprocal(denom, approx=True).astype(exp_dtype)    # approx recip on EUP slot
    att = (p * inv).astype(jnp.bfloat16)
    # aggregation: [N, N] @ [N, F]  (bf16 MXU inputs, f32 accumulation)
    return jnp.dot(att, wh.astype(jnp.bfloat16), preferred_element_type=jnp.float32)


# -----------------------------------------------------------------------------
# Fused 2-layer GAT kernel (layer 1: n_heads heads + ELU, layer 2: 1 head + ELU)
# -----------------------------------------------------------------------------
def _gat_fused_kernel(x_ref, xt_ref, p1_ref, s2t_ref, p2_ref, s2o_ref, bias_ref,
                      out_ref, *, n_heads, f_hid, nout_pad, alpha, exp_dtype):
    # ------------------------- layer 1 -------------------------
    # Wide projection for all heads + folded per-head query-score columns:
    #   p1 = [W_0 | ... | W_{H-1} | W_0 a1_0 | ... | W_{H-1} a1_{H-1}]
    wh_all = jnp.dot(x_ref[...], p1_ref[...],
                     preferred_element_type=jnp.float32)         # [N, H*f_hid + H]
    # Key scores for ALL heads with one matmul; result is already [H, N] so no
    # in-kernel transpose and no per-head degenerate dot_general is needed.
    wh2t = jnp.dot(s2t_ref[...], xt_ref[...],
                   preferred_element_type=jnp.float32)           # [H, N]

    hw = n_heads * f_hid
    heads = []
    for hd in range(n_heads):                                    # static unroll over heads
        wh = wh_all[:, hd * f_hid:(hd + 1) * f_hid]              # [N, f_hid]
        wh1_col = wh_all[:, hw + hd:hw + hd + 1]                 # [N, 1]
        wh2_row = wh2t[hd:hd + 1, :]                             # [1, N]
        heads.append(_head_attention(wh, wh1_col, wh2_row, bias_ref,
                                     alpha=alpha, exp_dtype=exp_dtype))
    h1 = heads[0] if n_heads == 1 else jnp.concatenate(heads, axis=1)   # [N, H*f_hid] f32
    # concat=True layer -> ELU; stored straight in bf16 (layer 2 feeds the MXU anyway).
    h1_bf = _elu(h1).astype(jnp.bfloat16)

    # ------------------------- layer 2 -------------------------
    # Projection zero-padded to a lane-dense multiple of 128 columns + folded a1 column:
    #   p2 = [W_out | 0-pad | W_out a1_out]
    w2_all = jnp.dot(h1_bf, p2_ref[...],
                     preferred_element_type=jnp.float32)         # [N, nout_pad + 1]
    wh_o = w2_all[:, :nout_pad]                                  # [N, nout_pad]
    wh1o_col = w2_all[:, nout_pad:nout_pad + 1]                  # [N, 1]
    wh2o_row = jax.lax.dot_general(                              # [1, N] key scores (bf16 MXU)
        s2o_ref[...], h1_bf,
        dimension_numbers=(((0,), (1,)), ((), ())),
        preferred_element_type=jnp.float32)
    hp = _head_attention(wh_o, wh1o_col, wh2o_row, bias_ref,
                         alpha=alpha, exp_dtype=exp_dtype)       # [N, nout_pad]
    # Final ELU (GAT applies F.elu after the output attention layer); padded cols stay 0.
    out_ref[...] = _elu(hp)                                      # single lane-dense f32 store


# -----------------------------------------------------------------------------
# Wrapper: weight folding + single pallas_call
# -----------------------------------------------------------------------------
def _softmax_exp_dtype():
    """bf16 exp only on chips with a bf16 EUP (v6e / v7x); f32 elsewhere (e.g. v5e)."""
    try:
        kind = jax.devices()[0].device_kind.lower()
    except Exception:
        return jnp.float32
    return jnp.bfloat16 if ("v6" in kind or "v7" in kind or "7x" in kind) else jnp.float32


def gat_forward(params, x, adj, *, alpha=0.2, nheads=8):
    """Fused 2-layer GAT forward (eval mode: dropout = identity).

    x: [N, nfeat] f32, adj: [N, N] (>0 means edge). Returns [N, nout] f32.
    """
    n_nodes, nfeat = x.shape
    nhid = params["W_all"].shape[1] // nheads
    nout = params["out_W"].shape[1]
    nout_pad = ((nout + 127) // 128) * 128        # lane-dense final store

    # Additive softmax mask: computed once, bf16 (halves bytes of the largest operand).
    bias = jnp.where(adj > 0, 0.0, -9000000000000000.0).astype(jnp.bfloat16)

    # ---- fold the a1/a2 score projections into the projection weights (wrapper-side) ----
    w3 = params["W_all"].reshape(nfeat, nheads, nhid)
    a1 = params["a1_rows"].reshape(nheads, nhid)
    a2 = params["a2_cols"].reshape(nheads, nhid)
    s1 = jnp.einsum("ihf,hf->ih", w3, a1)                        # [nfeat, H]   (W_h @ a1_h)
    s2t = jnp.einsum("ihf,hf->hi", w3, a2)                       # [H, nfeat]   (W_h @ a2_h)^T
    p1 = jnp.concatenate([params["W_all"], s1], axis=1)          # [nfeat, H*nhid + H]

    w_out = params["out_W"]                                      # [H*nhid, nout]
    s1o = w_out @ params["out_a1_rows"].T                        # [H*nhid, 1]
    s2o = w_out @ params["out_a2_cols"]                          # [H*nhid, 1]
    w_out_pad = jnp.concatenate(
        [w_out, jnp.zeros((w_out.shape[0], nout_pad - nout), w_out.dtype)], axis=1)
    p2 = jnp.concatenate([w_out_pad, s1o], axis=1)               # [H*nhid, nout_pad + 1]

    x_bf = x.astype(jnp.bfloat16)
    inputs = (x_bf, x_bf.T, p1.astype(jnp.bfloat16), s2t.astype(jnp.bfloat16),
              p2.astype(jnp.bfloat16), s2o.astype(jnp.bfloat16), bias)

    kernel = functools.partial(
        _gat_fused_kernel, n_heads=nheads, f_hid=nhid, nout_pad=nout_pad,
        alpha=alpha, exp_dtype=_softmax_exp_dtype())

    # Advisory cost estimate so XLA can schedule around the custom call.
    n2 = n_nodes * n_nodes
    flops = (2 * n_nodes * nfeat * (nheads * nhid + 2 * nheads)        # layer-1 proj + scores
             + nheads * (8 * n2 + 2 * n2 * nhid)                       # layer-1 softmax + agg
             + 2 * n_nodes * nheads * nhid * (nout_pad + 2)            # layer-2 proj + scores
             + 8 * n2 + 2 * n2 * nout_pad)                             # layer-2 softmax + agg
    transcendentals = (nheads + 1) * n2 + n_nodes * (nheads * nhid + nout_pad)
    bytes_accessed = sum(2 * v.size for v in inputs) + 4 * n_nodes * nout_pad

    # Rough resident working set (bf16 mask + a few f32 [N,N] softmax temps + operands);
    # raise the scoped VMEM limit above v5e's 16 MiB default, capped below physical VMEM.
    resident = (2 * n2 + 3 * 4 * n2 + sum(2 * v.size for v in inputs)
                + 4 * n_nodes * (nheads * nhid + nout_pad))
    vmem_limit = int(min(100 * 1024 * 1024, max(32 * 1024 * 1024, 2 * resident)))

    out = pl.pallas_call(
        kernel,
        out_shape=jax.ShapeDtypeStruct((n_nodes, nout_pad), jnp.float32),
        in_specs=[pl.BlockSpec(memory_space=pltpu.MemorySpace.VMEM)] * len(inputs),
        out_specs=pl.BlockSpec(memory_space=pltpu.MemorySpace.VMEM),
        compiler_params=pltpu.CompilerParams(vmem_limit_bytes=vmem_limit),
        cost_estimate=pl.CostEstimate(flops=int(flops),
                                      transcendentals=int(transcendentals),
                                      bytes_accessed=int(bytes_accessed)),
    )(*inputs)
    return out[:, :nout]


# -----------------------------------------------------------------------------
# Parameter init (xavier_uniform with gain=1.414, like the torch init)
# -----------------------------------------------------------------------------
def xavier_uniform(key, shape, gain=1.414):
    fan_in, fan_out = shape[0], shape[1]
    bound = gain * math.sqrt(6.0 / (fan_in + fan_out))
    return jax.random.uniform(key, shape, jnp.float32, -bound, bound)


def init_gat_params(key, nfeat, nhid, nout, nheads):
    keys = jax.random.split(key, 2 * nheads + 2)
    Ws, a1s, a2s = [], [], []
    for i in range(nheads):
        W = xavier_uniform(keys[2 * i], (nfeat, nhid))
        a = xavier_uniform(keys[2 * i + 1], (2 * nhid, 1))
        Ws.append(W)
        a1s.append(a[:nhid, :])
        a2s.append(a[nhid:, :])
    W_out = xavier_uniform(keys[-2], (nhid * nheads, nout))
    a_out = xavier_uniform(keys[-1], (2 * nout, 1))
    return {
        "W_all": jnp.concatenate(Ws, axis=1),                    # [nfeat, nheads*nhid]
        "a1_rows": jnp.concatenate([a.T for a in a1s], axis=1),  # [1, nheads*nhid]
        "a2_cols": jnp.concatenate(a2s, axis=0),                 # [nheads*nhid, 1]
        "out_W": W_out,                                          # [nheads*nhid, nout]
        "out_a1_rows": a_out[:nout, :].T,                        # [1, nout]
        "out_a2_cols": a_out[nout:, :],                          # [nout, 1]
    }


# -----------------------------------------------------------------------------
# Pure-JAX f32 reference (mirrors the PyTorch forward) for a loose sanity check
# -----------------------------------------------------------------------------
def gat_reference(params, x, adj, *, alpha=0.2, nheads=8):
    def layer(h, W_all, a1_rows, a2_cols, n_heads, f_out, elu):
        wh_all = h @ W_all
        outs = []
        for hd in range(n_heads):
            lo = hd * f_out
            wh = wh_all[:, lo:lo + f_out]
            wh1 = wh @ a1_rows[:, lo:lo + f_out].T
            wh2 = wh @ a2_cols[lo:lo + f_out, :]
            e = wh1 + wh2.T
            e = jnp.where(e > 0, e, alpha * e)
            att = jnp.where(adj > 0, e, -9000000000000000.0)
            att = jax.nn.softmax(att, axis=1)
            hp = att @ wh
            if elu:
                hp = jnp.where(hp > 0, hp, jnp.exp(jnp.minimum(hp, 0.0)) - 1.0)
            outs.append(hp)
        return jnp.concatenate(outs, axis=1)

    nhid = params["W_all"].shape[1] // nheads
    nout = params["out_W"].shape[1]
    h = layer(x, params["W_all"], params["a1_rows"], params["a2_cols"], nheads, nhid, True)
    return layer(h, params["out_W"], params["out_a1_rows"], params["out_a2_cols"], 1, nout, True)


if __name__ == "__main__":
    # Small, deterministic example.
    N_NODES, NFEAT, NHID, NOUT, NHEADS = 16, 32, 8, 16, 8

    key = jax.random.PRNGKey(0)
    k_x, k_adj, k_params = jax.random.split(key, 3)

    x = jax.random.normal(k_x, (N_NODES, NFEAT), dtype=jnp.float32)
    # random binary adjacency with self loops
    adj = (jax.random.uniform(k_adj, (N_NODES, N_NODES)) > 0.6).astype(jnp.float32)
    adj = jnp.maximum(adj, jnp.eye(N_NODES, dtype=jnp.float32))

    params = init_gat_params(k_params, NFEAT, NHID, NOUT, NHEADS)

    out = gat_forward(params, x, adj, nheads=NHEADS)
    jax.block_until_ready(out)

    assert out.shape == (N_NODES, NOUT), out.shape
    assert bool(jnp.all(jnp.isfinite(out)))

    # Loose tolerance: kernel uses bf16 MXU inputs / folded score weights with f32 accumulation.
    ref = gat_reference(params, x, adj, nheads=NHEADS)
    assert bool(jnp.allclose(out, ref, atol=2e-1, rtol=2e-1)), \
        float(jnp.max(jnp.abs(out - ref)))

    print("KERNEL_OK")
</pallas_src>

<mosaic_0001>
module attributes {stable_mosaic.version = 11 : i64} {
  func.func @_gat_fused_kernel(%arg0: memref<16x32xbf16, #tpu.memory_space<vmem>>, %arg1: memref<32x16xbf16, #tpu.memory_space<vmem>>, %arg2: memref<32x72xbf16, #tpu.memory_space<vmem>>, %arg3: memref<8x32xbf16, #tpu.memory_space<vmem>>, %arg4: memref<64x129xbf16, #tpu.memory_space<vmem>>, %arg5: memref<64x1xbf16, #tpu.memory_space<vmem>>, %arg6: memref<16x16xbf16, #tpu.memory_space<vmem>>, %arg7: memref<16x128xf32, #tpu.memory_space<vmem>>) attributes {dimension_semantics = [], scalar_prefetch = 0 : i64, scratch_operands = 0 : i64, tpu.core_type = #tpu.core_type<tc>} {
    %c0 = arith.constant 0 : index
    %c0_0 = arith.constant 0 : index
    %0 = vector.load %arg0[%c0, %c0_0] : memref<16x32xbf16, #tpu.memory_space<vmem>>, vector<16x32xbf16>
    %c0_1 = arith.constant 0 : index
    %c0_2 = arith.constant 0 : index
    %1 = vector.load %arg2[%c0_1, %c0_2] : memref<32x72xbf16, #tpu.memory_space<vmem>>, vector<32x72xbf16>
    %cst = arith.constant dense<0.000000e+00> : vector<16x72xf32>
    %2 = tpu.matmul %0, %1, %cst {dimension_numbers = #tpu.dot_dimension_numbers<[1], [0], [0], [1], [0, 0, 1, 1], [], []>} : vector<16x32xbf16>, vector<32x72xbf16>, vector<16x72xf32> -> vector<16x72xf32>
    %c0_3 = arith.constant 0 : index
    %c0_4 = arith.constant 0 : index
    %3 = vector.load %arg3[%c0_3, %c0_4] : memref<8x32xbf16, #tpu.memory_space<vmem>>, vector<8x32xbf16>
    %c0_5 = arith.constant 0 : index
    %c0_6 = arith.constant 0 : index
    %4 = vector.load %arg1[%c0_5, %c0_6] : memref<32x16xbf16, #tpu.memory_space<vmem>>, vector<32x16xbf16>
    %cst_7 = arith.constant dense<0.000000e+00> : vector<8x16xf32>
    %5 = tpu.matmul %3, %4, %cst_7 {dimension_numbers = #tpu.dot_dimension_numbers<[1], [0], [0], [1], [0, 0, 1, 1], [], []>} : vector<8x32xbf16>, vector<32x16xbf16>, vector<8x16xf32> -> vector<8x16xf32>
    %6 = vector.extract_strided_slice %2 {offsets = [0, 0], sizes = [16, 8], strides = [1, 1]} : vector<16x72xf32> to vector<16x8xf32>
    %7 = vector.extract_strided_slice %2 {offsets = [0, 64], sizes = [16, 1], strides = [1, 1]} : vector<16x72xf32> to vector<16x1xf32>
    %8 = vector.extract_strided_slice %5 {offsets = [0, 0], sizes = [1, 16], strides = [1, 1]} : vector<8x16xf32> to vector<1x16xf32>
    %9 = vector.broadcast %7 : vector<16x1xf32> to vector<16x16xf32>
    %10 = vector.broadcast %8 : vector<1x16xf32> to vector<16x16xf32>
    %11 = arith.addf %9, %10 : vector<16x16xf32>
    %cst_8 = arith.constant 0.000000e+00 : f32
    %12 = vector.broadcast %cst_8 : f32 to vector<16x16xf32>
    %13 = arith.cmpf ogt, %11, %12 : vector<16x16xf32>
    %cst_9 = arith.constant 2.000000e-01 : f32
    %14 = vector.broadcast %cst_9 : f32 to vector<16x16xf32>
    %15 = arith.mulf %14, %11 : vector<16x16xf32>
    %16 = arith.select %13, %11, %15 : vector<16x16xi1>, vector<16x16xf32>
    %c0_10 = arith.constant 0 : index
    %c0_11 = arith.constant 0 : index
    %17 = vector.load %arg6[%c0_10, %c0_11] : memref<16x16xbf16, #tpu.memory_space<vmem>>, vector<16x16xbf16>
    %18 = arith.extf %17 : vector<16x16xbf16> to vector<16x16xf32>
    %19 = arith.addf %16, %18 : vector<16x16xf32>
    %cst_12 = arith.constant dense<0xFF800000> : vector<16xf32>
    %20 = vector.multi_reduction <maximumf>, %19, %cst_12 [1] : vector<16x16xf32> to vector<16xf32>
    %21 = vector.shape_cast %20 : vector<16xf32> to vector<16x1xf32>
    %22 = vector.broadcast %21 : vector<16x1xf32> to vector<16x16xf32>
    %23 = arith.subf %19, %22 : vector<16x16xf32>
    %24 = math.exp %23 : vector<16x16xf32>
    %cst_13 = arith.constant dense<0.000000e+00> : vector<16xf32>
    %25 = vector.multi_reduction <add>, %24, %cst_13 [1] : vector<16x16xf32> to vector<16xf32>
    %26 = vector.shape_cast %25 : vector<16xf32> to vector<16x1xf32>
    %27 = tpu.reciprocal %26 {approx = true} : vector<16x1xf32> -> vector<16x1xf32>
    %28 = vector.broadcast %27 : vector<16x1xf32> to vector<16x16xf32>
    %29 = arith.mulf %24, %28 : vector<16x16xf32>
    %30 = arith.truncf %29 : vector<16x16xf32> to vector<16x16xbf16>
    %31 = arith.truncf %6 : vector<16x8xf32> to vector<16x8xbf16>
    %cst_14 = arith.constant dense<0.000000e+00> : vector<16x8xf32>
    %32 = tpu.matmul %30, %31, %cst_14 {dimension_numbers = #tpu.dot_dimension_numbers<[1], [0], [0], [1], [0, 0, 1, 1], [], []>} : vector<16x16xbf16>, vector<16x8xbf16>, vector<16x8xf32> -> vector<16x8xf32>
    %33 = vector.extract_strided_slice %2 {offsets = [0, 8], sizes = [16, 8], strides = [1, 1]} : vector<16x72xf32> to vector<16x8xf32>
    %34 = vector.extract_strided_slice %2 {offsets = [0, 65], sizes = [16, 1], strides = [1, 1]} : vector<16x72xf32> to vector<16x1xf32>
    %35 = vector.extract_strided_slice %5 {offsets = [1, 0], sizes = [1, 16], strides = [1, 1]} : vector<8x16xf32> to vector<1x16xf32>
    %36 = vector.broadcast %34 : vector<16x1xf32> to vector<16x16xf32>
    %37 = vector.broadcast %35 : vector<1x16xf32> to vector<16x16xf32>
    %38 = arith.addf %36, %37 : vector<16x16xf32>
    %cst_15 = arith.constant 0.000000e+00 : f32
    %39 = vector.broadcast %cst_15 : f32 to vector<16x16xf32>
    %40 = arith.cmpf ogt, %38, %39 : vector<16x16xf32>
    %cst_16 = arith.constant 2.000000e-01 : f32
    %41 = vector.broadcast %cst_16 : f32 to vector<16x16xf32>
    %42 = arith.mulf %41, %38 : vector<16x16xf32>
    %43 = arith.select %40, %38, %42 : vector<16x16xi1>, vector<16x16xf32>
    %c0_17 = arith.constant 0 : index
    %c0_18 = arith.constant 0 : index
    %44 = vector.load %arg6[%c0_17, %c0_18] : memref<16x16xbf16, #tpu.memory_space<vmem>>, vector<16x16xbf16>
    %45 = arith.extf %44 : vector<16x16xbf16> to vector<16x16xf32>
    %46 = arith.addf %43, %45 : vector<16x16xf32>
    %cst_19 = arith.constant dense<0xFF800000> : vector<16xf32>
    %47 = vector.multi_reduction <maximumf>, %46, %cst_19 [1] : vector<16x16xf32> to vector<16xf32>
    %48 = vector.shape_cast %47 : vector<16xf32> to vector<16x1xf32>
    %49 = vector.broadcast %48 : vector<16x1xf32> to vector<16x16xf32>
    %50 = arith.subf %46, %49 : vector<16x16xf32>
    %51 = math.exp %50 : vector<16x16xf32>
    %cst_20 = arith.constant dense<0.000000e+00> : vector<16xf32>
    %52 = vector.multi_reduction <add>, %51, %cst_20 [1] : vector<16x16xf32> to vector<16xf32>
    %53 = vector.shape_cast %52 : vector<16xf32> to vector<16x1xf32>
    %54 = tpu.reciprocal %53 {approx = true} : vector<16x1xf32> -> vector<16x1xf32>
    %55 = vector.broadcast %54 : vector<16x1xf32> to vector<16x16xf32>
    %56 = arith.mulf %51, %55 : vector<16x16xf32>
    %57 = arith.truncf %56 : vector<16x16xf32> to vector<16x16xbf16>
    %58 = arith.truncf %33 : vector<16x8xf32> to vector<16x8xbf16>
    %cst_21 = arith.constant dense<0.000000e+00> : vector<16x8xf32>
    %59 = tpu.matmul %57, %58, %cst_21 {dimension_numbers = #tpu.dot_dimension_numbers<[1], [0], [0], [1], [0, 0, 1, 1], [], []>} : vector<16x16xbf16>, vector<16x8xbf16>, vector<16x8xf32> -> vector<16x8xf32>
    %60 = vector.extract_strided_slice %2 {offsets = [0, 16], sizes = [16, 8], strides = [1, 1]} : vector<16x72xf32> to vector<16x8xf32>
    %61 = vector.extract_strided_slice %2 {offsets = [0, 66], sizes = [16, 1], strides = [1, 1]} : vector<16x72xf32> to vector<16x1xf32>
    %62 = vector.extract_strided_slice %5 {offsets = [2, 0], sizes = [1, 16], strides = [1, 1]} : vector<8x16xf32> to vector<1x16xf32>
    %63 = vector.broadcast %61 : vector<16x1xf32> to vector<16x16xf32>
    %64 = vector.broadcast %62 : vector<1x16xf32> to vector<16x16xf32>
    %65 = arith.addf %63, %64 : vector<16x16xf32>
    %cst_22 = arith.constant 0.000000e+00 : f32
    %66 = vector.broadcast %cst_22 : f32 to vector<16x16xf32>
    %67 = arith.cmpf ogt, %65, %66 : vector<16x16xf32>
    %cst_23 = arith.constant 2.000000e-01 : f32
    %68 = vector.broadcast %cst_23 : f32 to vector<16x16xf32>
    %69 = arith.mulf %68, %65 : vector<16x16xf32>
    %70 = arith.select %67, %65, %69 : vector<16x16xi1>, vector<16x16xf32>
    %c0_24 = arith.constant 0 : index
    %c0_25 = arith.constant 0 : index
    %71 = vector.load %arg6[%c0_24, %c0_25] : memref<16x16xbf16, #tpu.memory_space<vmem>>, vector<16x16xbf16>
    %72 = arith.extf %71 : vector<16x16xbf16> to vector<16x16xf32>
    %73 = arith.addf %70, %72 : vector<16x16xf32>
    %cst_26 = arith.constant dense<0xFF800000> : vector<16xf32>
    %74 = vector.multi_reduction <maximumf>, %73, %cst_26 [1] : vector<16x16xf32> to vector<16xf32>
    %75 = vector.shape_cast %74 : vector<16xf32> to vector<16x1xf32>
    %76 = vector.broadcast %75 : vector<16x1xf32> to vector<16x16xf32>
    %77 = arith.subf %73, %76 : vector<16x16xf32>
    %78 = math.exp %77 : vector<16x16xf32>
    %cst_27 = arith.constant dense<0.000000e+00> : vector<16xf32>
    %79 = vector.multi_reduction <add>, %78, %cst_27 [1] : vector<16x16xf32> to vector<16xf32>
    %80 = vector.shape_cast %79 : vector<16xf32> to vector<16x1xf32>
    %81 = tpu.reciprocal %80 {approx = true} : vector<16x1xf32> -> vector<16x1xf32>
    %82 = vector.broadcast %81 : vector<16x1xf32> to vector<16x16xf32>
    %83 = arith.mulf %78, %82 : vector<16x16xf32>
    %84 = arith.truncf %83 : vector<16x16xf32> to vector<16x16xbf16>
    %85 = arith.truncf %60 : vector<16x8xf32> to vector<16x8xbf16>
    %cst_28 = arith.constant dense<0.000000e+00> : vector<16x8xf32>
    %86 = tpu.matmul %84, %85, %cst_28 {dimension_numbers = #tpu.dot_dimension_numbers<[1], [0], [0], [1], [0, 0, 1, 1], [], []>} : vector<16x16xbf16>, vector<16x8xbf16>, vector<16x8xf32> -> vector<16x8xf32>
    %87 = vector.extract_strided_slice %2 {offsets = [0, 24], sizes = [16, 8], strides = [1, 1]} : vector<16x72xf32> to vector<16x8xf32>
    %88 = vector.extract_strided_slice %2 {offsets = [0, 67], sizes = [16, 1], strides = [1, 1]} : vector<16x72xf32> to vector<16x1xf32>
    %89 = vector.extract_strided_slice %5 {offsets = [3, 0], sizes = [1, 16], strides = [1, 1]} : vector<8x16xf32> to vector<1x16xf32>
    %90 = vector.broadcast %88 : vector<16x1xf32> to vector<16x16xf32>
    %91 = vector.broadcast %89 : vector<1x16xf32> to vector<16x16xf32>
    %92 = arith.addf %90, %91 : vector<16x16xf32>
    %cst_29 = arith.constant 0.000000e+00 : f32
    %93 = vector.broadcast %cst_29 : f32 to vector<16x16xf32>
    %94 = arith.cmpf ogt, %92, %93 : vector<16x16xf32>
    %cst_30 = arith.constant 2.000000e-01 : f32
    %95 = vector.broadcast %cst_30 : f32 to vector<16x16xf32>
    %96 = arith.mulf %95, %92 : vector<16x16xf32>
    %97 = arith.select %94, %92, %96 : vector<16x16xi1>, vector<16x16xf32>
    %c0_31 = arith.constant 0 : index
    %c0_32 = arith.constant 0 : index
    %98 = vector.load %arg6[%c0_31, %c0_32] : memref<16x16xbf16, #tpu.memory_space<vmem>>, vector<16x16xbf16>
    %99 = arith.extf %98 : vector<16x16xbf16> to vector<16x16xf32>
    %100 = arith.addf %97, %99 : vector<16x16xf32>
    %cst_33 = arith.constant dense<0xFF800000> : vector<16xf32>
    %101 = vector.multi_reduction <maximumf>, %100, %cst_33 [1] : vector<16x16xf32> to vector<16xf32>
    %102 = vector.shape_cast %101 : vector<16xf32> to vector<16x1xf32>
    %103 = vector.broadcast %102 : vector<16x1xf32> to vector<16x16xf32>
    %104 = arith.subf %100, %103 : vector<16x16xf32>
    %105 = math.exp %104 : vector<16x16xf32>
    %cst_34 = arith.constant dense<0.000000e+00> : vector<16xf32>
    %106 = vector.multi_reduction <add>, %105, %cst_34 [1] : vector<16x16xf32> to vector<16xf32>
    %107 = vector.shape_cast %106 : vector<16xf32> to vector<16x1xf32>
    %108 = tpu.reciprocal %107 {approx = true} : vector<16x1xf32> -> vector<16x1xf32>
    %109 = vector.broadcast %108 : vector<16x1xf32> to vector<16x16xf32>
    %110 = arith.mulf %105, %109 : vector<16x16xf32>
    %111 = arith.truncf %110 : vector<16x16xf32> to vector<16x16xbf16>
    %112 = arith.truncf %87 : vector<16x8xf32> to vector<16x8xbf16>
    %cst_35 = arith.constant dense<0.000000e+00> : vector<16x8xf32>
    %113 = tpu.matmul %111, %112, %cst_35 {dimension_numbers = #tpu.dot_dimension_numbers<[1], [0], [0], [1], [0, 0, 1, 1], [], []>} : vector<16x16xbf16>, vector<16x8xbf16>, vector<16x8xf32> -> vector<16x8xf32>
    %114 = vector.extract_strided_slice %2 {offsets = [0, 32], sizes = [16, 8], strides = [1, 1]} : vector<16x72xf32> to vector<16x8xf32>
    %115 = vector.extract_strided_slice %2 {offsets = [0, 68], sizes = [16, 1], strides = [1, 1]} : vector<16x72xf32> to vector<16x1xf32>
    %116 = vector.extract_strided_slice %5 {offsets = [4, 0], sizes = [1, 16], strides = [1, 1]} : vector<8x16xf32> to vector<1x16xf32>
    %117 = vector.broadcast %115 : vector<16x1xf32> to vector<16x16xf32>
    %118 = vector.broadcast %116 : vector<1x16xf32> to vector<16x16xf32>
    %119 = arith.addf %117, %118 : vector<16x16xf32>
    %cst_36 = arith.constant 0.000000e+00 : f32
    %120 = vector.broadcast %cst_36 : f32 to vector<16x16xf32>
    %121 = arith.cmpf ogt, %119, %120 : vector<16x16xf32>
    %cst_37 = arith.constant 2.000000e-01 : f32
    %122 = vector.broadcast %cst_37 : f32 to vector<16x16xf32>
    %123 = arith.mulf %122, %119 : vector<16x16xf32>
    %124 = arith.select %121, %119, %123 : vector<16x16xi1>, vector<16x16xf32>
    %c0_38 = arith.constant 0 : index
    %c0_39 = arith.constant 0 : index
    %125 = vector.load %arg6[%c0_38, %c0_39] : memref<16x16xbf16, #tpu.memory_space<vmem>>, vector<16x16xbf16>
    %126 = arith.extf %125 : vector<16x16xbf16> to vector<16x16xf32>
    %127 = arith.addf %124, %126 : vector<16x16xf32>
    %cst_40 = arith.constant dense<0xFF800000> : vector<16xf32>
    %128 = vector.multi_reduction <maximumf>, %127, %cst_40 [1] : vector<16x16xf32> to vector<16xf32>
    %129 = vector.shape_cast %128 : vector<16xf32> to vector<16x1xf32>
    %130 = vector.broadcast %129 : vector<16x1xf32> to vector<16x16xf32>
    %131 = arith.subf %127, %130 : vector<16x16xf32>
    %132 = math.exp %131 : vector<16x16xf32>
    %cst_41 = arith.constant dense<0.000000e+00> : vector<16xf32>
    %133 = vector.multi_reduction <add>, %132, %cst_41 [1] : vector<16x16xf32> to vector<16xf32>
    %134 = vector.shape_cast %133 : vector<16xf32> to vector<16x1xf32>
    %135 = tpu.reciprocal %134 {approx = true} : vector<16x1xf32> -> vector<16x1xf32>
    %136 = vector.broadcast %135 : vector<16x1xf32> to vector<16x16xf32>
    %137 = arith.mulf %132, %136 : vector<16x16xf32>
    %138 = arith.truncf %137 : vector<16x16xf32> to vector<16x16xbf16>
    %139 = arith.truncf %114 : vector<16x8xf32> to vector<16x8xbf16>
    %cst_42 = arith.constant dense<0.000000e+00> : vector<16x8xf32>
    %140 = tpu.matmul %138, %139, %cst_42 {dimension_numbers = #tpu.dot_dimension_numbers<[1], [0], [0], [1], [0, 0, 1, 1], [], []>} : vector<16x16xbf16>, vector<16x8xbf16>, vector<16x8xf32> -> vector<16x8xf32>
    %141 = vector.extract_strided_slice %2 {offsets = [0, 40], sizes = [16, 8], strides = [1, 1]} : vector<16x72xf32> to vector<16x8xf32>
    %142 = vector.extract_strided_slice %2 {offsets = [0, 69], sizes = [16, 1], strides = [1, 1]} : vector<16x72xf32> to vector<16x1xf32>
    %143 = vector.extract_strided_slice %5 {offsets = [5, 0], sizes = [1, 16], strides = [1, 1]} : vector<8x16xf32> to vector<1x16xf32>
    %144 = vector.broadcast %142 : vector<16x1xf32> to vector<16x16xf32>
    %145 = vector.broadcast %143 : vector<1x16xf32> to vector<16x16xf32>
    %146 = arith.addf %144, %145 : vector<16x16xf32>
    %cst_43 = arith.constant 0.000000e+00 : f32
    %147 = vector.broadcast %cst_43 : f32 to vector<16x16xf32>
    %148 = arith.cmpf ogt, %146, %147 : vector<16x16xf32>
    %cst_44 = arith.constant 2.000000e-01 : f32
    %149 = vector.broadcast %cst_44 : f32 to vector<16x16xf32>
    %150 = arith.mulf %149, %146 : vector<16x16xf32>
    %151 = arith.select %148, %146, %150 : vector<16x16xi1>, vector<16x16xf32>
    %c0_45 = arith.constant 0 : index
    %c0_46 = arith.constant 0 : index
    %152 = vector.load %arg6[%c0_45, %c0_46] : memref<16x16xbf16, #tpu.memory_space<vmem>>, vector<16x16xbf16>
    %153 = arith.extf %152 : vector<16x16xbf16> to vector<16x16xf32>
    %154 = arith.addf %151, %153 : vector<16x16xf32>
    %cst_47 = arith.constant dense<0xFF800000> : vector<16xf32>
    %155 = vector.multi_reduction <maximumf>, %154, %cst_47 [1] : vector<16x16xf32> to vector<16xf32>
    %156 = vector.shape_cast %155 : vector<16xf32> to vector<16x1xf32>
    %157 = vector.broadcast %156 : vector<16x1xf32> to vector<16x16xf32>
    %158 = arith.subf %154, %157 : vector<16x16xf32>
    %159 = math.exp %158 : vector<16x16xf32>
    %cst_48 = arith.constant dense<0.000000e+00> : vector<16xf32>
    %160 = vector.multi_reduction <add>, %159, %cst_48 [1] : vector<16x16xf32> to vector<16xf32>
    %161 = vector.shape_cast %160 : vector<16xf32> to vector<16x1xf32>
    %162 = tpu.reciprocal %161 {approx = true} : vector<16x1xf32> -> vector<16x1xf32>
    %163 = vector.broadcast %162 : vector<16x1xf32> to vector<16x16xf32>
    %164 = arith.mulf %159, %163 : vector<16x16xf32>
    %165 = arith.truncf %164 : vector<16x16xf32> to vector<16x16xbf16>
    %166 = arith.truncf %141 : vector<16x8xf32> to vector<16x8xbf16>
    %cst_49 = arith.constant dense<0.000000e+00> : vector<16x8xf32>
    %167 = tpu.matmul %165, %166, %cst_49 {dimension_numbers = #tpu.dot_dimension_numbers<[1], [0], [0], [1], [0, 0, 1, 1], [], []>} : vector<16x16xbf16>, vector<16x8xbf16>, vector<16x8xf32> -> vector<16x8xf32>
    %168 = vector.extract_strided_slice %2 {offsets = [0, 48], sizes = [16, 8], strides = [1, 1]} : vector<16x72xf32> to vector<16x8xf32>
    %169 = vector.extract_strided_slice %2 {offsets = [0, 70], sizes = [16, 1], strides = [1, 1]} : vector<16x72xf32> to vector<16x1xf32>
    %170 = vector.extract_strided_slice %5 {offsets = [6, 0], sizes = [1, 16], strides = [1, 1]} : vector<8x16xf32> to vector<1x16xf32>
    %171 = vector.broadcast %169 : vector<16x1xf32> to vector<16x16xf32>
    %172 = vector.broadcast %170 : vector<1x16xf32> to vector<16x16xf32>
    %173 = arith.addf %171, %172 : vector<16x16xf32>
    %cst_50 = arith.constant 0.000000e+00 : f32
    %174 = vector.broadcast %cst_50 : f32 to vector<16x16xf32>
    %175 = arith.cmpf ogt, %173, %174 : vector<16x16xf32>
    %cst_51 = arith.constant 2.000000e-01 : f32
    %176 = vector.broadcast %cst_51 : f32 to vector<16x16xf32>
    %177 = arith.mulf %176, %173 : vector<16x16xf32>
    %178 = arith.select %175, %173, %177 : vector<16x16xi1>, vector<16x16xf32>
    %c0_52 = arith.constant 0 : index
    %c0_53 = arith.constant 0 : index
    %179 = vector.load %arg6[%c0_52, %c0_53] : memref<16x16xbf16, #tpu.memory_space<vmem>>, vector<16x16xbf16>
    %180 = arith.extf %179 : vector<16x16xbf16> to vector<16x16xf32>
    %181 = arith.addf %178, %180 : vector<16x16xf32>
    %cst_54 = arith.constant dense<0xFF800000> : vector<16xf32>
    %182 = vector.multi_reduction <maximumf>, %181, %cst_54 [1] : vector<16x16xf32> to vector<16xf32>
    %183 = vector.shape_cast %182 : vector<16xf32> to vector<16x1xf32>
    %184 = vector.broadcast %183 : vector<16x1xf32> to vector<16x16xf32>
    %185 = arith.subf %181, %184 : vector<16x16xf32>
    %186 = math.exp %185 : vector<16x16xf32>
    %cst_55 = arith.constant dense<0.000000e+00> : vector<16xf32>
    %187 = vector.multi_reduction <add>, %186, %cst_55 [1] : vector<16x16xf32> to vector<16xf32>
    %188 = vector.shape_cast %187 : vector<16xf32> to vector<16x1xf32>
    %189 = tpu.reciprocal %188 {approx = true} : vector<16x1xf32> -> vector<16x1xf32>
    %190 = vector.broadcast %189 : vector<16x1xf32> to vector<16x16xf32>
    %191 = arith.mulf %186, %190 : vector<16x16xf32>
    %192 = arith.truncf %191 : vector<16x16xf32> to vector<16x16xbf16>
    %193 = arith.truncf %168 : vector<16x8xf32> to vector<16x8xbf16>
    %cst_56 = arith.constant dense<0.000000e+00> : vector<16x8xf32>
    %194 = tpu.matmul %192, %193, %cst_56 {dimension_numbers = #tpu.dot_dimension_numbers<[1], [0], [0], [1], [0, 0, 1, 1], [], []>} : vector<16x16xbf16>, vector<16x8xbf16>, vector<16x8xf32> -> vector<16x8xf32>
    %195 = vector.extract_strided_slice %2 {offsets = [0, 56], sizes = [16, 8], strides = [1, 1]} : vector<16x72xf32> to vector<16x8xf32>
    %196 = vector.extract_strided_slice %2 {offsets = [0, 71], sizes = [16, 1], strides = [1, 1]} : vector<16x72xf32> to vector<16x1xf32>
    %197 = vector.extract_strided_slice %5 {offsets = [7, 0], sizes = [1, 16], strides = [1, 1]} : vector<8x16xf32> to vector<1x16xf32>
    %198 = vector.broadcast %196 : vector<16x1xf32> to vector<16x16xf32>
    %199 = vector.broadcast %197 : vector<1x16xf32> to vector<16x16xf32>
    %200 = arith.addf %198, %199 : vector<16x16xf32>
    %cst_57 = arith.constant 0.000000e+00 : f32
    %201 = vector.broadcast %cst_57 : f32 to vector<16x16xf32>
    %202 = arith.cmpf ogt, %200, %201 : vector<16x16xf32>
    %cst_58 = arith.constant 2.000000e-01 : f32
    %203 = vector.broadcast %cst_58 : f32 to vector<16x16xf32>
    %204 = arith.mulf %203, %200 : vector<16x16xf32>
    %205 = arith.select %202, %200, %204 : vector<16x16xi1>, vector<16x16xf32>
    %c0_59 = arith.constant 0 : index
    %c0_60 = arith.constant 0 : index
    %206 = vector.load %arg6[%c0_59, %c0_60] : memref<16x16xbf16, #tpu.memory_space<vmem>>, vector<16x16xbf16>
    %207 = arith.extf %206 : vector<16x16xbf16> to vector<16x16xf32>
    %208 = arith.addf %205, %207 : vector<16x16xf32>
    %cst_61 = arith.constant dense<0xFF800000> : vector<16xf32>
    %209 = vector.multi_reduction <maximumf>, %208, %cst_61 [1] : vector<16x16xf32> to vector<16xf32>
    %210 = vector.shape_cast %209 : vector<16xf32> to vector<16x1xf32>
    %211 = vector.broadcast %210 : vector<16x1xf32> to vector<16x16xf32>
    %212 = arith.subf %208, %211 : vector<16x16xf32>
    %213 = math.exp %212 : vector<16x16xf32>
    %cst_62 = arith.constant dense<0.000000e+00> : vector<16xf32>
    %214 = vector.multi_reduction <add>, %213, %cst_62 [1] : vector<16x16xf32> to vector<16xf32>
    %215 = vector.shape_cast %214 : vector<16xf32> to vector<16x1xf32>
    %216 = tpu.reciprocal %215 {approx = true} : vector<16x1xf32> -> vector<16x1xf32>
    %217 = vector.broadcast %216 : vector<16x1xf32> to vector<16x16xf32>
    %218 = arith.mulf %213, %217 : vector<16x16xf32>
    %219 = arith.truncf %218 : vector<16x16xf32> to vector<16x16xbf16>
    %220 = arith.truncf %195 : vector<16x8xf32> to vector<16x8xbf16>
    %cst_63 = arith.constant dense<0.000000e+00> : vector<16x8xf32>
    %221 = tpu.matmul %219, %220, %cst_63 {dimension_numbers = #tpu.dot_dimension_numbers<[1], [0], [0], [1], [0, 0, 1, 1], [], []>} : vector<16x16xbf16>, vector<16x8xbf16>, vector<16x8xf32> -> vector<16x8xf32>
    %222 = tpu.concatenate %32, %59, %86, %113, %140, %167, %194, %221 in 1 : vector<16x8xf32>, vector<16x8xf32>, vector<16x8xf32>, vector<16x8xf32>, vector<16x8xf32>, vector<16x8xf32>, vector<16x8xf32>, vector<16x8xf32> -> vector<16x64xf32>
    %cst_64 = arith.constant 0.000000e+00 : f32
    %223 = vector.broadcast %cst_64 : f32 to vector<16x64xf32>
    %224 = arith.cmpf ogt, %222, %223 : vector<16x64xf32>
    %cst_65 = arith.constant 0.000000e+00 : f32
    %225 = vector.broadcast %cst_65 : f32 to vector<16x64xf32>
    %226 = arith.minimumf %222, %225 : vector<16x64xf32>
    %227 = math.exp %226 : vector<16x64xf32>
    %cst_66 = arith.constant 1.000000e+00 : f32
    %228 = vector.broadcast %cst_66 : f32 to vector<16x64xf32>
    %229 = arith.subf %227, %228 : vector<16x64xf32>
    %230 = arith.select %224, %222, %229 : vector<16x64xi1>, vector<16x64xf32>
    %231 = arith.truncf %230 : vector<16x64xf32> to vector<16x64xbf16>
    %c0_67 = arith.constant 0 : index
    %c0_68 = arith.constant 0 : index
    %232 = vector.load %arg4[%c0_67, %c0_68] : memref<64x129xbf16, #tpu.memory_space<vmem>>, vector<64x129xbf16>
    %cst_69 = arith.constant dense<0.000000e+00> : vector<16x129xf32>
    %233 = tpu.matmul %231, %232, %cst_69 {dimension_numbers = #tpu.dot_dimension_numbers<[1], [0], [0], [1], [0, 0, 1, 1], [], []>} : vector<16x64xbf16>, vector<64x129xbf16>, vector<16x129xf32> -> vector<16x129xf32>
    %234 = vector.extract_strided_slice %233 {offsets = [0, 0], sizes = [16, 128], strides = [1, 1]} : vector<16x129xf32> to vector<16x128xf32>
    %235 = vector.extract_strided_slice %233 {offsets = [0, 128], sizes = [16, 1], strides = [1, 1]} : vector<16x129xf32> to vector<16x1xf32>
    %c0_70 = arith.constant 0 : index
    %c0_71 = arith.constant 0 : index
    %236 = vector.load %arg5[%c0_70, %c0_71] : memref<64x1xbf16, #tpu.memory_space<vmem>>, vector<64x1xbf16>
    %cst_72 = arith.constant dense<0.000000e+00> : vector<1x16xf32>
    %237 = tpu.matmul %236, %231, %cst_72 {dimension_numbers = #tpu.dot_dimension_numbers<[0], [1], [1], [0], [0, 1, 1, 0], [], []>} : vector<64x1xbf16>, vector<16x64xbf16>, vector<1x16xf32> -> vector<1x16xf32>
    %238 = vector.broadcast %235 : vector<16x1xf32> to vector<16x16xf32>
    %239 = vector.broadcast %237 : vector<1x16xf32> to vector<16x16xf32>
    %240 = arith.addf %238, %239 : vector<16x16xf32>
    %cst_73 = arith.constant 0.000000e+00 : f32
    %241 = vector.broadcast %cst_73 : f32 to vector<16x16xf32>
    %242 = arith.cmpf ogt, %240, %241 : vector<16x16xf32>
    %cst_74 = arith.constant 2.000000e-01 : f32
    %243 = vector.broadcast %cst_74 : f32 to vector<16x16xf32>
    %244 = arith.mulf %243, %240 : vector<16x16xf32>
    %245 = arith.select %242, %240, %244 : vector<16x16xi1>, vector<16x16xf32>
    %c0_75 = arith.constant 0 : index
    %c0_76 = arith.constant 0 : index
    %246 = vector.load %arg6[%c0_75, %c0_76] : memref<16x16xbf16, #tpu.memory_space<vmem>>, vector<16x16xbf16>
    %247 = arith.extf %246 : vector<16x16xbf16> to vector<16x16xf32>
    %248 = arith.addf %245, %247 : vector<16x16xf32>
    %cst_77 = arith.constant dense<0xFF800000> : vector<16xf32>
    %249 = vector.multi_reduction <maximumf>, %248, %cst_77 [1] : vector<16x16xf32> to vector<16xf32>
    %250 = vector.shape_cast %249 : vector<16xf32> to vector<16x1xf32>
    %251 = vector.broadcast %250 : vector<16x1xf32> to vector<16x16xf32>
    %252 = arith.subf %248, %251 : vector<16x16xf32>
    %253 = math.exp %252 : vector<16x16xf32>
    %cst_78 = arith.constant dense<0.000000e+00> : vector<16xf32>
    %254 = vector.multi_reduction <add>, %253, %cst_78 [1] : vector<16x16xf32> to vector<16xf32>
    %255 = vector.shape_cast %254 : vector<16xf32> to vector<16x1xf32>
    %256 = tpu.reciprocal %255 {approx = true} : vector<16x1xf32> -> vector<16x1xf32>
    %257 = vector.broadcast %256 : vector<16x1xf32> to vector<16x16xf32>
    %258 = arith.mulf %253, %257 : vector<16x16xf32>
    %259 = arith.truncf %258 : vector<16x16xf32> to vector<16x16xbf16>
    %260 = arith.truncf %234 : vector<16x128xf32> to vector<16x128xbf16>
    %cst_79 = arith.constant dense<0.000000e+00> : vector<16x128xf32>
    %261 = tpu.matmul %259, %260, %cst_79 {dimension_numbers = #tpu.dot_dimension_numbers<[1], [0], [0], [1], [0, 0, 1, 1], [], []>} : vector<16x16xbf16>, vector<16x128xbf16>, vector<16x128xf32> -> vector<16x128xf32>
    %cst_80 = arith.constant 0.000000e+00 : f32
    %262 = vector.broadcast %cst_80 : f32 to vector<16x128xf32>
    %263 = arith.cmpf ogt, %261, %262 : vector<16x128xf32>
    %cst_81 = arith.constant 0.000000e+00 : f32
    %264 = vector.broadcast %cst_81 : f32 to vector<16x128xf32>
    %265 = arith.minimumf %261, %264 : vector<16x128xf32>
    %266 = math.exp %265 : vector<16x128xf32>
    %cst_82 = arith.constant 1.000000e+00 : f32
    %267 = vector.broadcast %cst_82 : f32 to vector<16x128xf32>
    %268 = arith.subf %266, %267 : vector<16x128xf32>
    %269 = arith.select %263, %261, %268 : vector<16x128xi1>, vector<16x128xf32>
    %c0_83 = arith.constant 0 : index
    %c0_84 = arith.constant 0 : index
    %270 = vector.load %arg7[%c0_83, %c0_84] : memref<16x128xf32, #tpu.memory_space<vmem>>, vector<16x128xf32>
    tpu.vector_store %arg7[%c0_83, %c0_84], %269 {strides = array<i32>} : memref<16x128xf32, #tpu.memory_space<vmem>>, vector<16x128xf32>,
    return
  }
}

</mosaic_0001>

<bundles_post_ra>
// kernel: tpu_custom_call.1
= control target key start
LH: loop header
LB: loop body
LE: loop exit
PB: predicated region body
PF: predicated region fallthrough
CT: control target
= control target key end

     0   :  { %12 = vsyncpa [#allocation3], 0  ;;  %s2179_s0 = inlined_call_operand.hbm [shape: bf16[16,32], index: 0, kind: input, shape index: {}]   ;;  %s2180_s1 = inlined_call_operand.vmem [shape: bf16[32,16], index: 1, kind: input, shape index: {}]   ;;  %s2181_s2 = inlined_call_operand.hbm [shape: bf16[32,72], index: 2, kind: input, shape index: {}]   ;;  %s2182_s3 = inlined_call_operand.hbm [shape: bf16[8,32], index: 3, kind: input, shape index: {}]   ;;  %s2183_s4 = inlined_call_operand.vmem [shape: bf16[64,129], index: 4, kind: input, shape index: {}]   ;;  %s2184_s5 = inlined_call_operand.vmem [shape: bf16[64,1], index: 5, kind: input, shape index: {}]   ;;  %s2185_s6 = inlined_call_operand.hbm [shape: bf16[16,16], index: 6, kind: input, shape index: {}]   ;;  %s2186_s7 = inlined_call_operand.hbm [shape: f32[16,128], index: 7, kind: output, shape index: {}]  }
   0x1   :  { %13 = vsyncpa [#allocation6], 0 }
   0x2   :  { %14 = vsyncpa [#allocation9], 0 }
   0x3   :  { %15 = vsyncpa [#allocation4], 0  ;;  %s1748_s24 = smov [#allocation5]   ;;  %s1749_s26 = smov [#allocation2]  }
   0x4   :  { %s35_s25 = sshll.u32 %s1748_s24, 4  ;;  %s21_s27 = sshll.u32 %s1749_s26, 4  ;;  %s36_s25 = int_to_ptr.vmem [resolvable:$true] %s35_s25  ;;  %s22_s27 = int_to_ptr.vmem [resolvable:$true] %s21_s27 }
   0x5   :  { %s1648_s28 = scalar_lea.vmem %s36_s25, 256  ;;  %p1653_p1 = scmp.lt.s32.totalorder %s36_s25, %s36_s25 }
   0x6   :  { %p1649_p0 = scmp.ne.s32.totalorder %s36_s25, %s1648_s28  ;;  %p1654_p2 = scmp.lt.s32.totalorder %s1648_s28, %s1648_s28 }
   0x8   :  { %p1655_p3 = por %p1654_p2, %p1653_p1 }
   0xa   :  { %p1656_p4 = pnand %p1655_p3, %p1649_p0 }
   0xc   :  { %1659 = shalt.err (!%p1656_p4)
}
   0xd   :  { %s1750_s29 = smov 64   ;;  %s1751_s30 = smov 4  }
   0xe   :  { %41 = dma.hbm_to_vmem [thread:$0]  %s2181_s2, 256, %s36_s25, [#allocation6], %s1750_s29, %s1750_s29, %s1751_s30  }
   0xf   :  { %s1668_s10 = scalar_lea.vmem %s22_s27, 128  ;;  %p1673_p6 = scmp.lt.s32.totalorder %s22_s27, %s22_s27 }
  0x10   :  { %p1669_p5 = scmp.ne.s32.totalorder %s22_s27, %s1668_s10  ;;  %p1674_p7 = scmp.lt.s32.totalorder %s1668_s10, %s1668_s10 }
  0x12   :  { %p1675_p8 = por %p1674_p7, %p1673_p6 }
  0x14   :  { %p1676_p9 = pnand %p1675_p8, %p1669_p5 }
  0x16   :  { %1679 = shalt.err (!%p1676_p9)
}
  0x17   :  { %27 = dma.hbm_to_vmem [thread:$0]  %s2179_s0, 128, %s22_s27, [#allocation3], %s1750_s29, %s1750_s29, %s1751_s30  }
  0x18   :  { %s1752_s13 = smov [#allocation7]   ;;  %s1753_s15 = smov [#allocation8]  }
  0x19   :  { %s48_s14 = sshll.u32 %s1752_s13, 4  ;;  %s61_s16 = sshll.u32 %s1753_s15, 4  ;;  %s49_s14 = int_to_ptr.vmem [resolvable:$true] %s48_s14  ;;  %s62_s16 = int_to_ptr.vmem [resolvable:$true] %s61_s16 }
  0x1a   :  { %s1688_s2 = scalar_lea.vmem %s49_s14, 64  ;;  %p1693_p11 = scmp.lt.s32.totalorder %s49_s14, %s49_s14 }
  0x1b   :  { %p1689_p10 = scmp.ne.s32.totalorder %s49_s14, %s1688_s2  ;;  %p1694_p12 = scmp.lt.s32.totalorder %s1688_s2, %s1688_s2 }
  0x1d   :  { %p1695_p13 = por %p1694_p12, %p1693_p11 }
  0x1f   :  { %p1696_p0 = pnand %p1695_p13, %p1689_p10 }
  0x21   :  { %1699 = shalt.err (!%p1696_p0)
}
  0x22   :  { %51 = dma.hbm_to_vmem [thread:$0]  %s2182_s3, 64, %s49_s14, [#allocation6]  }
  0x23   :  { %s1708_s19 = scalar_lea.vmem %s62_s16, 128  ;;  %p1713_p2 = scmp.lt.s32.totalorder %s62_s16, %s62_s16 }
  0x24   :  { %p1709_p1 = scmp.ne.s32.totalorder %s62_s16, %s1708_s19  ;;  %p1714_p3 = scmp.lt.s32.totalorder %s1708_s19, %s1708_s19 }
  0x26   :  { %p1715_p4 = por %p1714_p3, %p1713_p2 }
  0x28   :  { %p1716_p5 = pnand %p1715_p4, %p1709_p1 }
  0x2a   :  { %1719 = shalt.err (!%p1716_p5)
}
  0x2b   :  { %67 = dma.hbm_to_vmem [thread:$0]  %s2185_s6, 128, %s62_s16, [#allocation9], %s1750_s29, %s1750_s29, %s1751_s30  }
  0x2c   :  { %1740 = dma.done.wait [#allocation3], 128  }
  0x2d   :  { %1741 = vsyncadd [#allocation3], 4294967168 }
  0x2e   :  { %1742 = dma.done.wait [#allocation6], 320  }
  0x2f   :  { %1743 = vsyncadd [#allocation6], 4294966976 }
  0x30   :  { %1744 = dma.done.wait [#allocation9], 128  }
  0x31   :  { %1745 = vsyncadd [#allocation9], 4294967168  ;;  %v1754_v0 = vmov 0.0   ;;  %vm1755_vm0 = vmmov 0   ;;  %v1756_v1 = vmov 65   ;;  %v1757_v2 = vmov 64  }
  0x32   :  { %1414 = vmatprep.subr.bf16.mxu0 %v1754_v0  ;;  %1418 = vmatprep.mubr.msk.bf16.mxu0 %vm1755_vm0, %v1754_v0  ;;  %v1539_v3 = vld [vmem:[#allocation5 + $0x8] sm:$0xff]   ;;  %v1540_v4 = vld [vmem:[#allocation5] sm:$0xff]   ;;  %v1541_v6 = vld [vmem:[#allocation2] sm:$0xff]   ;;  %vm104_vm1 = vcmask 261120   ;;  %v1758_v14 = vmov 67   ;;  %v1759_v15 = vmov 66   ;;  %v219_v24 = vlaneseq }
  0x33   :  { %1422 = vmatprep.subr.bf16.mxu1 %v1754_v0  ;;  %1426 = vmatprep.mubr.msk.bf16.mxu1 %vm1755_vm0, %v1754_v0  ;;  %v1542_v5 = vld [vmem:[%s2180_s1 + $0x8] sm:$0xff]   ;;  %v1543_v7 = vld [vmem:[%s2180_s1] sm:$0xff]   ;;  %v149_v8 = vld [vmem:[#allocation7] sm:$0xf]  ;;  %v1760_v20 = vmov 68   ;;  %v1761_v21 = vmov 69  }
  0x34   :  { %1524 = vset.pattern.permute.xlu1 %v1756_v1  ;;  %1523 = vset.pattern.permute.xlu0 %v1757_v2  ;;  %v1762_v22 = vmov 70   ;;  %v1763_v23 = vmov 71   ;;  %v1870_v25 = vshrl.u32 %v219_v24, 7  ;;  %v1385_v32 = vld [vmem:[#allocation8] sm:$0xff]   ;;  %vm237_vm4 = vcmask 130048   ;;  %s1764_s1 = smov 120  }
  0x35   :  { %1415 = vmatpush3.bf16.msra.mxu0 %v1539_v3  ;;  %1423 = vmatpush3.bf16.msra.mxu1 %v1542_v5  ;;  %v1882_v39 = vunpack.c.l.bf16 %v1385_v32  ;;  %s1765_s23 = smov 104   ;;  %s1766_s24 = smov 96  }
  0x36   :  { %1416 = vmatprep.subr.bf16.mxu0 %v1754_v0  ;;  %1424 = vmatprep.subr.bf16.mxu1 %v1754_v0  ;;  %v316_v26 = vsub.s32 1, %v1870_v25  ;;  %v221_v27 = vsub.s32 0, %v1870_v25  ;;  %v501_v30 = vsub.s32 3, %v1870_v25  ;;  %v409_v31 = vsub.s32 2, %v1870_v25  ;;  %s1767_s25 = smov 112   ;;  %s1768_s26 = smov 88  }
  0x37   :  { %v593_v45 = vsub.s32 4, %v1870_v25  ;;  %s1769_s27 = smov 80   ;;  %s1770_s28 = smov 72  }
  0x38   :  { %s1771_s29 = smov 8   ;;  %s1772_s30 = smov 16  }
  0x39   :  { %1417 = vmatpush3.bf16.msra.mxu0 %v1540_v4  ;;  %1425 = vmatpush3.bf16.msra.mxu1 %v1543_v7  ;;  %v1907_v4 = vunpack.c.h.bf16 %v1385_v32  ;;  %v685_v7 = vsub.s32 5, %v1870_v25  ;;  %s1773_s8 = smov 24   ;;  %s1774_s9 = smov 32  }
  0x3a   :  { %1430 = vmatprep.subr.bf16.mxu0 %v1754_v0  ;;  %1436 = vmatprep.subr.bf16.mxu1 %v1754_v0  ;;  %s1775_s10 = smov 40   ;;  %s1776_s11 = smov 48  }
  0x3b   :  { %s1777_s14 = smov 56  }
  0x3c   :  { %1419 = vmatmul.mubr.msk.bf16.vlgmr.msra.gmra.mxu0 %vm104_vm1, %v1541_v6  ;;  %1427 = vmatmul.mubr.msk.bf16.vlgmr.msra.gmra.mxu1 %vm104_vm1, %v149_v8 }
  0x3d   :  { %1432 = vmatprep.mubr.msk.bf16.mxu0 %vm1755_vm0, %v1754_v0  ;;  %1438 = vmatprep.mubr.msk.bf16.mxu1 %vm1755_vm0, %v1754_v0 }
  0xfc   :  { %v142_v9 = vpop.f32.mrf.mxu0  ;;  %v1864_v11 = vpop.f32.mrf.mxu1 }
  0xfd   :  { %307 = vperm.xlu1 %1524, %v142_v9   ;;  %211 = vperm.xlu0 %1523, %v142_v9   ;;  %v317_v28 = vrot.slane %v1864_v11, %v316_v26  ;;  %v222_v29 = vrot.slane %v1864_v11, %v221_v27  ;;  %v502_v37 = vrot.slane %v1864_v11, %v501_v30 }
  0xfe   :  { %v1420_v10 = vpop.f32.mrf.mxu0  ;;  %v1428_v16 = vpop.f32.mrf.mxu1  ;;  %v410_v38 = vrot.slane %v1864_v11, %v409_v31  ;;  %v1894_v54 = vrot.slane %v1864_v11, %v593_v45 }
 0x100   :  { %v145_v12 = vpop.f32.mrf.mxu0  ;;  %v206_v18 = vpop.f32.mrf.mxu1 }
 0x101   :  { %v1866_v13 = vpack.c.bf16 %v145_v12, %v142_v9  ;;  %1526 = vset.pattern.permute.xlu1 %v1758_v14  ;;  %1525 = vset.pattern.permute.xlu0 %v1759_v15 }
 0x102   :  { %492 = vperm.xlu1 %1526, %v142_v9   ;;  %400 = vperm.xlu0 %1525, %v142_v9   ;;  %v1421_v17 = vpop.f32.mrf.mxu0  ;;  %v1429_v19 = vpop.f32.mrf.mxu1 }
 0x103   :  { %1431 = vmatpush3.bf16.msra.mxu0 %v1866_v13  ;;  %v686_v17 = vrot.slane %v1864_v11, %v685_v7 }
 0x104   :  { %1442 = vmatprep.subr.bf16.mxu0 %v1754_v0 }
 0x106   :  { %1527 = vset.pattern.permute.xlu1 %v1760_v20  ;;  %1528 = vset.pattern.permute.xlu0 %v1757_v2 }
 0x107   :  { %584 = vperm.xlu1 %1527, %v142_v9   ;;  %216 = vperm.xlu0 %1528, %v145_v12  }
 0x10b   :  { %1529 = vset.pattern.permute.xlu1 %v1756_v1  ;;  %1531 = vset.pattern.permute.xlu0 %v1758_v14 }
 0x10c   :  { %311 = vperm.xlu1 %1529, %v145_v12   ;;  %496 = vperm.xlu0 %1531, %v145_v12  }
 0x110   :  { %1530 = vset.pattern.permute.xlu1 %v1759_v15  ;;  %1532 = vset.pattern.permute.xlu0 %v1761_v21 }
 0x111   :  { %404 = vperm.xlu1 %1530, %v145_v12   ;;  %676 = vperm.xlu0 %1532, %v142_v9  }
 0x115   :  { %1533 = vset.pattern.permute.xlu1 %v1762_v22  ;;  %1537 = vset.pattern.permute.xlu0 %v1762_v22 }
 0x116   :  { %768 = vperm.xlu1 %1533, %v142_v9   ;;  %772 = vperm.xlu0 %1537, %v145_v12  }
 0x11a   :  { %1534 = vset.pattern.permute.xlu1 %v1760_v20 }
 0x11b   :  { %588 = vperm.xlu1 %1534, %v145_v12  }
 0x11f   :  { %1535 = vset.pattern.permute.xlu1 %v1761_v21  ;;  %v777_v21 = vsub.s32 6, %v1870_v25 }
 0x120   :  { %680 = vperm.xlu1 %1535, %v145_v12  }
 0x124   :  { %1536 = vset.pattern.permute.xlu1 %v1763_v23 }
 0x125   :  { %860 = vperm.xlu1 %1536, %v142_v9  }
 0x129   :  { %864 = vperm.xlu1 %1536, %v145_v12  }
 0x178   :  { %v308_v33 = vpop.permute.xlu1 %307  ;;  %v212_v34 = vpop.permute.xlu0 %211 }
 0x179   :  { %v318_v35 = vadd.f32 %v317_v28, %v308_v33  ;;  %v223_v36 = vadd.f32 %v222_v29, %v212_v34  ;;  %v778_v33 = vrot.slane %v1864_v11, %v777_v21 }
 0x17b   :  { %vm320_vm2 = vcmp.gt.f32.partialorder %v318_v35, 0.0  ;;  %v322_v40 = vmul.f32 0.2, %v318_v35  ;;  %vm225_vm3 = vcmp.gt.f32.partialorder %v223_v36, 0.0  ;;  %v227_v41 = vmul.f32 0.2, %v223_v36 }
 0x17d   :  { %v493_v42 = vpop.permute.xlu1 %492  ;;  %v401_v43 = vpop.permute.xlu0 %400  ;;  %v229_v44 = vsel %vm225_vm3, %v223_v36, %v227_v41  ;;  %v324_v46 = vsel %vm320_vm2, %v318_v35, %v322_v40 }
 0x17e   :  { %v503_v47 = vadd.f32 %v502_v37, %v493_v42  ;;  %v411_v48 = vadd.f32 %v410_v38, %v401_v43  ;;  %v1886_v49 = vadd.f32 %v1882_v39, %v229_v44  ;;  %v1889_v50 = vadd.f32 %v1882_v39, %v324_v46 }
 0x180   :  { %vm505_vm5 = vcmp.gt.f32.partialorder %v503_v47, 0.0  ;;  %v507_v51 = vmul.f32 0.2, %v503_v47  ;;  %vm413_vm6 = vcmp.gt.f32.partialorder %v411_v48, 0.0  ;;  %v415_v52 = vmul.f32 0.2, %v411_v48 }
 0x181   :  { %v238_v53 = vsel %vm237_vm4, %v1886_v49, -inf  ;;  %v328_v62 = vsel %vm237_vm4, %v1889_v50, -inf }
 0x182   :  { %239 = vmax.xlane.f32.xlu0 %v238_v53  ;;  %v585_v55 = vpop.permute.xlu1 %584  ;;  %v217_v56 = vpop.permute.xlu0 %216  ;;  %v417_v57 = vsel %vm413_vm6, %v411_v48, %v415_v52  ;;  %v509_v58 = vsel %vm505_vm5, %v503_v47, %v507_v51  ;;  %vm1007_vm6 = vcmask 64512  }
 0x183   :  { %v595_v59 = vadd.f32 %v1894_v54, %v585_v55  ;;  %v224_v60 = vadd.f32 %v222_v29, %v217_v56  ;;  %v1898_v61 = vadd.f32 %v1882_v39, %v417_v57  ;;  %v1903_v2 = vadd.f32 %v1882_v39, %v509_v58 }
 0x185   :  { %v599_v63 = vmul.f32 0.2, %v595_v59  ;;  %vm226_vm7 = vcmp.gt.f32.partialorder %v224_v60, 0.0  ;;  %v228_v1 = vmul.f32 0.2, %v224_v60  ;;  %vm597_vm8 = vcmp.gt.f32.partialorder %v595_v59, 0.0 }
 0x186   :  { %329 = vmax.xlane.f32.xlu0 %v328_v62  ;;  %v421_v3 = vsel %vm237_vm4, %v1898_v61, -inf  ;;  %v513_v10 = vsel %vm237_vm4, %v1903_v2, -inf  ;;  %v869_v62 = vsub.s32 7, %v1870_v25 }
 0x187   :  { %422 = vmax.xlane.f32.xlu1 %v421_v3  ;;  %v312_v5 = vpop.permute.xlu1 %311  ;;  %v497_v6 = vpop.permute.xlu0 %496  ;;  %v230_v8 = vsel %vm226_vm7, %v224_v60, %v228_v1  ;;  %v601_v12 = vsel %vm597_vm8, %v595_v59, %v599_v63  ;;  %vm1012_vm7 = vcmask 195584   ;;  %vm1017_vm8 = vcmask 326656  }
 0x188   :  { %v319_v9 = vadd.f32 %v317_v28, %v312_v5  ;;  %v504_v15 = vadd.f32 %v502_v37, %v497_v6  ;;  %v1913_v16 = vadd.f32 %v1907_v4, %v230_v8  ;;  %v1921_v26 = vadd.f32 %v1882_v39, %v601_v12 }
 0x189   :  { %v870_v6 = vrot.slane %v1864_v11, %v869_v62 }
 0x18a   :  { %vm321_vm9 = vcmp.gt.f32.partialorder %v319_v9, 0.0  ;;  %v323_v14 = vmul.f32 0.2, %v319_v9  ;;  %vm506_vm10 = vcmp.gt.f32.partialorder %v504_v15, 0.0  ;;  %v508_v28 = vmul.f32 0.2, %v504_v15 }
 0x18b   :  { %514 = vmax.xlane.f32.xlu1 %v513_v10  ;;  %v241_v29 = vsel %vm237_vm4, %v1913_v16, -inf  ;;  %v605_v35 = vsel %vm237_vm4, %v1921_v26, -inf }
 0x18c   :  { %v405_v18 = vpop.permute.xlu1 %404  ;;  %v677_v19 = vpop.permute.xlu0 %676  ;;  %v325_v20 = vsel %vm321_vm9, %v319_v9, %v323_v14  ;;  %v510_v42 = vsel %vm506_vm10, %v504_v15, %v508_v28  ;;  %vm1020_vm9 = vcmask 392192   ;;  %vm1023_vm10 = vcmask 457728  }
 0x18d   :  { %v412_v22 = vadd.f32 %v410_v38, %v405_v18  ;;  %v687_v23 = vadd.f32 %v686_v17, %v677_v19  ;;  %v1918_v24 = vadd.f32 %v1907_v4, %v325_v20  ;;  %v1942_v47 = vadd.f32 %v1907_v4, %v510_v42 }
 0x18f   :  { %vm414_vm11 = vcmp.gt.f32.partialorder %v412_v22, 0.0  ;;  %v416_v30 = vmul.f32 0.2, %v412_v22  ;;  %vm689_vm12 = vcmp.gt.f32.partialorder %v687_v23, 0.0  ;;  %v691_v31 = vmul.f32 0.2, %v687_v23  ;;  %242 = vmax.xlane.f32.xlu1 %v241_v29 }
 0x190   :  { %v331_v32 = vsel %vm237_vm4, %v1918_v24, -inf  ;;  %v516_v57 = vsel %vm237_vm4, %v1942_v47, -inf }
 0x191   :  { %332 = vmax.xlane.f32.xlu0 %v331_v32  ;;  %v769_v34 = vpop.permute.xlu1 %768  ;;  %v418_v36 = vsel %vm414_vm11, %v412_v22, %v416_v30  ;;  %v693_v37 = vsel %vm689_vm12, %v687_v23, %v691_v31  ;;  %v773_v44 = vpop.permute.xlu0 %772 }
 0x192   :  { %v779_v38 = vadd.f32 %v778_v33, %v769_v34  ;;  %v1931_v40 = vadd.f32 %v1907_v4, %v418_v36  ;;  %v1934_v41 = vadd.f32 %v1882_v39, %v693_v37  ;;  %v780_v55 = vadd.f32 %v778_v33, %v773_v44 }
 0x193   :  { %606 = vmax.xlane.f32.xlu1 %v605_v35 }
 0x194   :  { %vm781_vm13 = vcmp.gt.f32.partialorder %v779_v38, 0.0  ;;  %v783_v43 = vmul.f32 0.2, %v779_v38  ;;  %v424_v45 = vsel %vm237_vm4, %v1931_v40, -inf  ;;  %v697_v46 = vsel %vm237_vm4, %v1934_v41, -inf }
 0x195   :  { %425 = vmax.xlane.f32.xlu0 %v424_v45  ;;  %vm782_vm15 = vcmp.gt.f32.partialorder %v780_v55, 0.0 }
 0x196   :  { %v589_v48 = vpop.permute.xlu1 %588  ;;  %v785_v51 = vsel %vm781_vm13, %v779_v38, %v783_v43  ;;  %vm1087_vm13 = vcmask 523264  }
 0x197   :  { %v596_v52 = vadd.f32 %v1894_v54, %v589_v48  ;;  %698 = vmax.xlane.f32.xlu1 %v697_v46  ;;  %v1946_v53 = vadd.f32 %v1882_v39, %v785_v51  ;;  %v784_v54 = vmul.f32 0.2, %v780_v55 }
 0x199   :  { %vm598_vm14 = vcmp.gt.f32.partialorder %v596_v52, 0.0  ;;  %v600_v56 = vmul.f32 0.2, %v596_v52  ;;  %v789_v58 = vsel %vm237_vm4, %v1946_v53, -inf  ;;  %517 = vmax.xlane.f32.xlu0 %v516_v57  ;;  %v786_v9 = vsel %vm782_vm15, %v780_v55, %v784_v54 }
 0x19b   :  { %790 = vmax.xlane.f32.xlu1 %v789_v58  ;;  %v681_v59 = vpop.permute.xlu1 %680  ;;  %v602_v60 = vsel %vm598_vm14, %v596_v52, %v600_v56 }
 0x19c   :  { %v688_v63 = vadd.f32 %v686_v17, %v681_v59  ;;  %v1954_v1 = vadd.f32 %v1907_v4, %v602_v60  ;;  %v1965_v17 = vadd.f32 %v1907_v4, %v786_v9 }
 0x19e   :  { %vm690_vm2 = vcmp.gt.f32.partialorder %v688_v63, 0.0  ;;  %v692_v3 = vmul.f32 0.2, %v688_v63  ;;  %v608_v5 = vsel %vm237_vm4, %v1954_v1, -inf  ;;  %v792_v22 = vsel %vm237_vm4, %v1965_v17, -inf }
 0x19f   :  { %609 = vmax.xlane.f32.xlu0 %v608_v5 }
 0x1a0   :  { %v861_v7 = vpop.permute.xlu1 %860  ;;  %v694_v8 = vsel %vm690_vm2, %v688_v63, %v692_v3 }
 0x1a1   :  { %v871_v10 = vadd.f32 %v870_v6, %v861_v7  ;;  %v1960_v12 = vadd.f32 %v1907_v4, %v694_v8 }
 0x1a3   :  { %vm873_vm3 = vcmp.gt.f32.partialorder %v871_v10, 0.0  ;;  %v875_v14 = vmul.f32 0.2, %v871_v10  ;;  %v700_v15 = vsel %vm237_vm4, %v1960_v12, -inf }
 0x1a4   :  { %v865_v18 = vpop.permute.xlu1 %864  ;;  %701 = vmax.xlane.f32.xlu0 %v700_v15 }
 0x1a5   :  { %v872_v19 = vadd.f32 %v870_v6, %v865_v18  ;;  %v877_v20 = vsel %vm873_vm3, %v871_v10, %v875_v14 }
 0x1a6   :  { %v1968_v11 = vadd.f32 %v1882_v39, %v877_v20 }
 0x1a7   :  { %vm874_vm5 = vcmp.gt.f32.partialorder %v872_v19, 0.0  ;;  %v876_v21 = vmul.f32 0.2, %v872_v19 }
 0x1a8   :  { %793 = vmax.xlane.f32.xlu0 %v792_v22  ;;  %v881_v23 = vsel %vm237_vm4, %v1968_v11, -inf }
 0x1a9   :  { %882 = vmax.xlane.f32.xlu1 %v881_v23  ;;  %v878_v28 = vsel %vm874_vm5, %v872_v19, %v876_v21 }
 0x1aa   :  { %v1975_v29 = vadd.f32 %v1907_v4, %v878_v28 }
 0x1ac   :  { %v884_v30 = vsel %vm237_vm4, %v1975_v29, -inf }
 0x1ad   :  { %885 = vmax.xlane.f32.xlu0 %v884_v30 }
 0x1ba   :  { %352 = vrot.lane.b32.xlu1 %v1866_v13, %s1764_s1 }
 0x1be   :  { %536 = vrot.lane.b32.xlu1 %v1866_v13, %s1765_s23 }
 0x1c2   :  { %628 = vrot.lane.b32.xlu1 %v1866_v13, %s1766_s24 }
 0x1c3   :  { %444 = vrot.lane.b32.xlu0 %v1866_v13, %s1767_s25 }
 0x1c7   :  { %720 = vrot.lane.b32.xlu0 %v1866_v13, %s1768_s26 }
 0x20b   :  { %v240_v31 = vpop.xlane.xlu0 %239 }
 0x20c   :  { %v244_v32 = vsub.f32 %v1886_v49, %v240_v31 }
 0x20e   :  { %v246_v33 = vmul.f32 1.442695, %v244_v32 }
 0x20f   :  { %v330_v34 = vpop.xlane.xlu0 %329 }
 0x210   :  { %1560 = vpow2.f32 %v246_v33  ;;  %v334_v35 = vsub.f32 %v1889_v50, %v330_v34  ;;  %v423_v36 = vpop.xlane.xlu1 %422 }
 0x211   :  { %v427_v37 = vsub.f32 %v1898_v61, %v423_v36 }
 0x212   :  { %v336_v38 = vmul.f32 1.442695, %v334_v35 }
 0x213   :  { %v429_v42 = vmul.f32 1.442695, %v427_v37 }
 0x214   :  { %1562 = vpow2.f32 %v336_v38  ;;  %v515_v43 = vpop.xlane.xlu1 %514 }
 0x215   :  { %v519_v44 = vsub.f32 %v1903_v2, %v515_v43  ;;  %1564 = vpow2.f32 %v429_v42 }
 0x217   :  { %v521_v45 = vmul.f32 1.442695, %v519_v44 }
 0x218   :  { %v243_v46 = vpop.xlane.xlu1 %242 }
 0x219   :  { %v245_v48 = vsub.f32 %v1913_v16, %v243_v46  ;;  %1566 = vpow2.f32 %v521_v45 }
 0x21a   :  { %v333_v49 = vpop.xlane.xlu0 %332 }
 0x21b   :  { %v248_v51 = vmul.f32 1.442695, %v245_v48  ;;  %v335_v52 = vsub.f32 %v1918_v24, %v333_v49 }
 0x21c   :  { %v607_v50 = vpop.xlane.xlu1 %606 }
 0x21d   :  { %v1990_v55 = vpop.eup %1560  ;;  %1568 = vpow2.f32 %v248_v51  ;;  %v338_v61 = vmul.f32 1.442695, %v335_v52  ;;  %v611_v56 = vsub.f32 %v1921_v26, %v607_v50 }
 0x21e   :  { %v250_v2 = vsel %vm237_vm4, %v1990_v55, 0.0  ;;  %v426_v58 = vpop.xlane.xlu0 %425 }
 0x21f   :  { %1570 = vpow2.f32 %v338_v61  ;;  %v613_v57 = vmul.f32 1.442695, %v611_v56  ;;  %251 = vadd.xlane.f32.xlu1 %v250_v2  ;;  %v428_v16 = vsub.f32 %v1931_v40, %v426_v58 }
 0x220   :  { %v699_v59 = vpop.xlane.xlu1 %698 }
 0x221   :  { %v1996_v60 = vpop.eup %1562  ;;  %1572 = vpow2.f32 %v613_v57  ;;  %v703_v24 = vsub.f32 %v1934_v41, %v699_v59  ;;  %v431_v62 = vmul.f32 1.442695, %v428_v16 }
 0x222   :  { %v340_v54 = vsel %vm237_vm4, %v1996_v60, 0.0  ;;  %v2001_v26 = vpop.eup %1564  ;;  %v518_v3 = vpop.xlane.xlu0 %517 }
 0x223   :  { %v705_v63 = vmul.f32 1.442695, %v703_v24  ;;  %341 = vadd.xlane.f32.xlu1 %v340_v54  ;;  %1574 = vpow2.f32 %v431_v62  ;;  %v520_v5 = vsub.f32 %v1942_v47, %v518_v3  ;;  %v433_v41 = vsel %vm237_vm4, %v2001_v26, 0.0 }
 0x224   :  { %v791_v6 = vpop.xlane.xlu1 %790 }
 0x225   :  { %1576 = vpow2.f32 %v705_v63  ;;  %v795_v40 = vsub.f32 %v1946_v53, %v791_v6  ;;  %v523_v7 = vmul.f32 1.442695, %v520_v5 }
 0x226   :  { %v2007_v8 = vpop.eup %1566 }
 0x227   :  { %v797_v9 = vmul.f32 1.442695, %v795_v40  ;;  %434 = vadd.xlane.f32.xlu1 %v433_v41  ;;  %1578 = vpow2.f32 %v523_v7  ;;  %v525_v47 = vsel %vm237_vm4, %v2007_v8, 0.0 }
 0x228   :  { %v610_v10 = vpop.xlane.xlu0 %609 }
 0x229   :  { %1580 = vpow2.f32 %v797_v9  ;;  %v612_v14 = vsub.f32 %v1954_v1, %v610_v10 }
 0x22a   :  { %v2010_v15 = vpop.eup %1568 }
 0x22b   :  { %v615_v18 = vmul.f32 1.442695, %v612_v14  ;;  %526 = vadd.xlane.f32.xlu1 %v525_v47  ;;  %v253_v53 = vsel %vm237_vm4, %v2010_v15, 0.0 }
 0x22c   :  { %v2016_v19 = vpop.eup %1570  ;;  %254 = vadd.xlane.f32.xlu0 %v253_v53 }
 0x22d   :  { %1582 = vpow2.f32 %v615_v18  ;;  %v702_v20 = vpop.xlane.xlu0 %701  ;;  %v343_v1 = vsel %vm237_vm4, %v2016_v19, 0.0 }
 0x22e   :  { %v2018_v21 = vpop.eup %1572  ;;  %v704_v22 = vsub.f32 %v1960_v12, %v702_v20 }
 0x22f   :  { %v617_v23 = vsel %vm237_vm4, %v2018_v21, 0.0 }
 0x230   :  { %v707_v28 = vmul.f32 1.442695, %v704_v22  ;;  %344 = vadd.xlane.f32.xlu0 %v343_v1  ;;  %618 = vadd.xlane.f32.xlu1 %v617_v23  ;;  %v2025_v30 = vpop.eup %1574 }
 0x231   :  { %v794_v31 = vpop.xlane.xlu0 %793  ;;  %v436_v12 = vsel %vm237_vm4, %v2025_v30, 0.0 }
 0x232   :  { %v2027_v32 = vpop.eup %1576  ;;  %1584 = vpow2.f32 %v707_v28  ;;  %v796_v33 = vsub.f32 %v1965_v17, %v794_v31  ;;  %v883_v34 = vpop.xlane.xlu1 %882 }
 0x233   :  { %v887_v35 = vsub.f32 %v1968_v11, %v883_v34  ;;  %v709_v36 = vsel %vm237_vm4, %v2027_v32, 0.0 }
 0x234   :  { %v799_v37 = vmul.f32 1.442695, %v796_v33  ;;  %437 = vadd.xlane.f32.xlu0 %v436_v12  ;;  %710 = vadd.xlane.f32.xlu1 %v709_v36  ;;  %v2035_v38 = vpop.eup %1578 }
 0x235   :  { %v889_v42 = vmul.f32 1.442695, %v887_v35  ;;  %v528_v45 = vsel %vm237_vm4, %v2035_v38, 0.0 }
 0x236   :  { %v2037_v43 = vpop.eup %1580  ;;  %1586 = vpow2.f32 %v799_v37  ;;  %v886_v44 = vpop.xlane.xlu0 %885 }
 0x237   :  { %v353_v17 = vpop.permute.xlu1 %352  ;;  %1588 = vpow2.f32 %v889_v42  ;;  %v888_v11 = vsub.f32 %v1975_v29, %v886_v44  ;;  %v801_v46 = vsel %vm237_vm4, %v2037_v43, 0.0 }
 0x238   :  { %1437 = vmatpush3.bf16.msra.mxu1 %v353_v17  ;;  %529 = vadd.xlane.f32.xlu0 %v528_v45 }
 0x239   :  { %802 = vadd.xlane.f32.xlu1 %v801_v46  ;;  %v891_v48 = vmul.f32 1.442695, %v888_v11  ;;  %1448 = vmatprep.subr.bf16.mxu1 %v1754_v0 }
 0x23a   :  { %v2045_v49 = vpop.eup %1582  ;;  %v445_v62 = vpop.permute.xlu0 %444 }
 0x23b   :  { %1590 = vpow2.f32 %v891_v48  ;;  %v620_v51 = vsel %vm237_vm4, %v2045_v49, 0.0  ;;  %v537_v16 = vpop.permute.xlu1 %536 }
 0x23c   :  { %621 = vadd.xlane.f32.xlu0 %v620_v51 }
 0x23e   :  { %v2067_v63 = vpop.permute.xlu0 %720 }
 0x23f   :  { %v2049_v52 = vpop.eup %1584  ;;  %v629_v59 = vpop.permute.xlu1 %628 }
 0x240   :  { %v712_v29 = vsel %vm237_vm4, %v2049_v52, 0.0 }
 0x241   :  { %713 = vadd.xlane.f32.xlu0 %v712_v29 }
 0x243   :  { %v2053_v50 = vpop.eup %1586 }
 0x244   :  { %v2055_v61 = vpop.eup %1588  ;;  %v804_v56 = vsel %vm237_vm4, %v2053_v50, 0.0 }
 0x245   :  { %805 = vadd.xlane.f32.xlu0 %v804_v56  ;;  %v893_v2 = vsel %vm237_vm4, %v2055_v61, 0.0 }
 0x246   :  { %894 = vadd.xlane.f32.xlu1 %v893_v2 }
 0x248   :  { %v2061_v57 = vpop.eup %1590 }
 0x249   :  { %v896_v58 = vsel %vm237_vm4, %v2061_v57, 0.0 }
 0x24a   :  { %897 = vadd.xlane.f32.xlu0 %v896_v58 }
 0x257   :  { %812 = vrot.lane.b32.xlu1 %v1866_v13, %s1769_s27 }
 0x260   :  { %904 = vrot.lane.b32.xlu0 %v1866_v13, %s1770_s28 }
 0x2a8   :  { %v252_v24 = vpop.xlane.xlu1 %251 }
 0x2a9   :  { %1592 = vrcp.f32 %v252_v24 }
 0x2ac   :  { %v342_v54 = vpop.xlane.xlu1 %341 }
 0x2b0   :  { %v435_v3 = vpop.xlane.xlu1 %434 }
 0x2b4   :  { %v527_v6 = vpop.xlane.xlu1 %526 }
 0x2b5   :  { %v255_v5 = vpop.xlane.xlu0 %254 }
 0x2b6   :  { %1594 = vrcp.f32 %v255_v5  ;;  %v1593_v13 = vpop.eup %1592 }
 0x2b7   :  { %1596 = vrcp.f32 %v342_v54  ;;  %v258_v47 = vmul.f32 %v1593_v13, %v1990_v55 }
 0x2b9   :  { %v345_v40 = vpop.xlane.xlu0 %344  ;;  %v619_v41 = vpop.xlane.xlu1 %618 }
 0x2ba   :  { %1598 = vrcp.f32 %v345_v40 }
 0x2bb   :  { %1600 = vrcp.f32 %v435_v3 }
 0x2bd   :  { %v438_v7 = vpop.xlane.xlu0 %437  ;;  %v711_v14 = vpop.xlane.xlu1 %710 }
 0x2be   :  { %1602 = vrcp.f32 %v438_v7 }
 0x2bf   :  { %1604 = vrcp.f32 %v527_v6 }
 0x2c1   :  { %v530_v9 = vpop.xlane.xlu0 %529 }
 0x2c2   :  { %1606 = vrcp.f32 %v530_v9  ;;  %v803_v55 = vpop.xlane.xlu1 %802 }
 0x2c3   :  { %v1595_v10 = vpop.eup %1594  ;;  %1608 = vrcp.f32 %v619_v41 }
 0x2c4   :  { %v259_v18 = vmul.f32 %v1595_v10, %v2010_v15  ;;  %v1597_v53 = vpop.eup %1596 }
 0x2c5   :  { %v622_v20 = vpop.xlane.xlu0 %621  ;;  %v348_v23 = vmul.f32 %v1597_v53, %v1996_v60 }
 0x2c6   :  { %1610 = vrcp.f32 %v622_v20  ;;  %v260_v22 = vpack.c.bf16 %v259_v18, %v258_v47 }
 0x2c7   :  { %v1599_v1 = vpop.eup %1598  ;;  %1612 = vrcp.f32 %v711_v14 }
 0x2c8   :  { %1433 = vmatmul.mubr.msk.bf16.vlgmr.msra.gmra.mxu0 %vm237_vm4, %v260_v22  ;;  %v349_v28 = vmul.f32 %v1599_v1, %v2016_v19  ;;  %v1601_v31 = vpop.eup %1600 }
 0x2c9   :  { %1443 = vmatpush3.bf16.msra.mxu0 %v445_v62  ;;  %1444 = vmatprep.mubr.msk.bf16.mxu0 %vm1755_vm0, %v1754_v0  ;;  %v441_v12 = vmul.f32 %v1601_v31, %v2001_v26 }
 0x2ca   :  { %v714_v33 = vpop.xlane.xlu0 %713  ;;  %v350_v15 = vpack.c.bf16 %v349_v28, %v348_v23  ;;  %1454 = vmatprep.subr.bf16.mxu0 %v1754_v0 }
 0x2cb   :  { %v1603_v34 = vpop.eup %1602  ;;  %1614 = vrcp.f32 %v714_v33 }
 0x2cc   :  { %1439 = vmatmul.mubr.msk.bf16.vlgmr.msra.gmra.mxu1 %vm237_vm4, %v350_v15  ;;  %v442_v60 = vmul.f32 %v1603_v34, %v2025_v30  ;;  %v1605_v19 = vpop.eup %1604  ;;  %1616 = vrcp.f32 %v803_v55 }
 0x2cd   :  { %1449 = vmatpush3.bf16.msra.mxu1 %v537_v16  ;;  %1450 = vmatprep.mubr.msk.bf16.mxu1 %vm1755_vm0, %v1754_v0  ;;  %v533_v44 = vmul.f32 %v1605_v19, %v2007_v8  ;;  %v1546_v19 = vld [vmem:[%s2183_s4 + $0x34] ss:$8 sps:$4 sm:$0xff]  }
 0x2ce   :  { %v806_v35 = vpop.xlane.xlu0 %805  ;;  %v443_v36 = vpack.c.bf16 %v442_v60, %v441_v12  ;;  %1460 = vmatprep.subr.bf16.mxu1 %v1754_v0 }
 0x2cf   :  { %v1607_v37 = vpop.eup %1606  ;;  %1618 = vrcp.f32 %v806_v35  ;;  %v895_v42 = vpop.xlane.xlu1 %894 }
 0x2d0   :  { %1445 = vmatmul.mubr.msk.bf16.vlgmr.msra.gmra.mxu0 %vm237_vm4, %v443_v36  ;;  %v534_v26 = vmul.f32 %v1607_v37, %v2035_v38  ;;  %v1609_v30 = vpop.eup %1608  ;;  %1620 = vrcp.f32 %v895_v42  ;;  %v1544_v36 = vld [vmem:[%s2183_s4 + $0x30] ss:$8 sps:$4 sm:$0xff]  }
 0x2d1   :  { %1455 = vmatpush3.bf16.msra.mxu0 %v629_v59  ;;  %1456 = vmatprep.mubr.msk.bf16.mxu0 %vm1755_vm0, %v1754_v0  ;;  %v625_v46 = vmul.f32 %v1609_v30, %v2018_v21 }
 0x2d2   :  { %v535_v17 = vpack.c.bf16 %v534_v26, %v533_v44  ;;  %1466 = vmatprep.subr.bf16.mxu0 %v1754_v0  ;;  %v1549_v44 = vld [vmem:[%s2183_s4 + $0x24] ss:$8 sps:$4 sm:$0xff]   ;;  %v1547_v26 = vld [vmem:[%s2183_s4 + $0x20] ss:$8 sps:$4 sm:$0xff]  }
 0x2d3   :  { %v1611_v45 = vpop.eup %1610  ;;  %v898_v11 = vpop.xlane.xlu0 %897 }
 0x2d4   :  { %1622 = vrcp.f32 %v898_v11  ;;  %1451 = vmatmul.mubr.msk.bf16.vlgmr.msra.gmra.mxu1 %vm237_vm4, %v535_v17  ;;  %v626_v8 = vmul.f32 %v1611_v45, %v2045_v49  ;;  %v1613_v38 = vpop.eup %1612  ;;  %v813_v29 = vpop.permute.xlu1 %812  ;;  %v1552_v17 = vld [vmem:[%s2183_s4 + $0x14] ss:$8 sps:$4 sm:$0xff]   ;;  %v1550_v45 = vld [vmem:[%s2183_s4 + $0x10] ss:$8 sps:$4 sm:$0xff]   ;;  %v1555_v11 = vld [vmem:[%s2183_s4 + $0x4] ss:$8 sps:$4 sm:$0xff]  }
 0x2d5   :  { %1461 = vmatpush3.bf16.msra.mxu1 %v2067_v63  ;;  %1462 = vmatprep.mubr.msk.bf16.mxu1 %vm1755_vm0, %v1754_v0  ;;  %v717_v56 = vmul.f32 %v1613_v38, %v2027_v32  ;;  %v1556_v38 = vld [vmem:[%s2184_s5] sm:$0xff]  }
 0x2d6   :  { %v627_v48 = vpack.c.bf16 %v626_v8, %v625_v46  ;;  %1472 = vmatprep.subr.bf16.mxu1 %v1754_v0  ;;  %v1553_v46 = vld [vmem:[%s2183_s4] ss:$8 sps:$4 sm:$0xff]   ;;  %v1778_v8 = vmov 0  }
 0x2d7   :  { %v905_v16 = vpop.permute.xlu0 %904  ;;  %1538 = vset.pattern.permute.xlu0 %v1778_v8 }
 0x2d8   :  { %v1615_v51 = vpop.eup %1614  ;;  %1457 = vmatmul.mubr.msk.bf16.vlgmr.msra.gmra.mxu0 %vm237_vm4, %v627_v48  ;;  %v1557_v48 = vld [vmem:[%s2184_s5 + $0x8] sm:$0xff]  }
 0x2d9   :  { %1467 = vmatpush3.bf16.msra.mxu0 %v813_v29  ;;  %v718_v21 = vmul.f32 %v1615_v51, %v2049_v52  ;;  %1468 = vmatprep.mubr.msk.bf16.mxu0 %vm1755_vm0, %v1754_v0  ;;  %v1617_v49 = vpop.eup %1616  ;;  %v1558_v51 = vld [vmem:[%s2184_s5 + $0x10] sm:$0xff]   ;;  %v1559_v29 = vld [vmem:[%s2184_s5 + $0x18] sm:$0xff]   ;;  %s1779_s5 = smov [#allocation10]  }
 0x2da   :  { %v809_v59 = vmul.f32 %v1617_v49, %v2037_v43  ;;  %1099 = vmatprep.subr.bf16.mxu0 %v1546_v19 }
 0x2db   :  { %v719_v2 = vpack.c.bf16 %v718_v21, %v717_v56 }
 0x2dc   :  { %v1619_v58 = vpop.eup %1618 }
 0x2dd   :  { %1463 = vmatmul.mubr.msk.bf16.vlgmr.msra.gmra.mxu1 %vm237_vm4, %v719_v2  ;;  %v810_v24 = vmul.f32 %v1619_v58, %v2053_v50  ;;  %v1621_v32 = vpop.eup %1620 }
 0x2de   :  { %1473 = vmatpush3.bf16.msra.mxu1 %v905_v16  ;;  %1474 = vmatprep.mubr.msk.bf16.mxu1 %vm1755_vm0, %v1754_v0  ;;  %v901_v54 = vmul.f32 %v1621_v32, %v2055_v61 }
 0x2df   :  { %v811_v62 = vpack.c.bf16 %v810_v24, %v809_v59  ;;  %1478 = vmatprep.subr.bf16.mxu1 %v1754_v0 }
 0x2e1   :  { %v1623_v52 = vpop.eup %1622  ;;  %1469 = vmatmul.mubr.msk.bf16.vlgmr.msra.gmra.mxu0 %vm237_vm4, %v811_v62 }
 0x2e2   :  { %v902_v63 = vmul.f32 %v1623_v52, %v2061_v57  ;;  %1100 = vmatpush1.bf16.msra.mxu0 %v1544_v36  ;;  %1123 = vmatprep.mubr.bf16.mxu0 %v1778_v8 }
 0x2e3   :  { %1101 = vmatprep.subr.bf16.mxu0 %v1549_v44 }
 0x2e4   :  { %v903_v3 = vpack.c.bf16 %v902_v63, %v901_v54 }
 0x2e6   :  { %1475 = vmatmul.mubr.msk.bf16.vlgmr.msra.gmra.mxu1 %vm237_vm4, %v903_v3  ;;  %1102 = vmatpush1.bf16.msra.mxu0 %v1547_v26 }
 0x2e7   :  { %1480 = vmatprep.mubr.msk.bf16.mxu1 %vm1755_vm0, %v1754_v0  ;;  %1103 = vmatprep.subr.bf16.mxu0 %v1552_v17 }
 0x2ea   :  { %1104 = vmatpush1.bf16.msra.mxu0 %v1550_v45 }
 0x2eb   :  { %1105 = vmatprep.subr.bf16.mxu0 %v1555_v11 }
 0x2ee   :  { %1106 = vmatpush1.bf16.msra.mxu0 %v1553_v46 }
 0x388   :  { %v2113_v43 = vpop.f32.mrf.mxu0 }
 0x38a   :  { %v1434_v50 = vpop.f32.mrf.mxu0 }
 0x38c   :  { %v2115_v5 = vpop.f32.mrf.mxu0  ;;  %v392_v6 = vpop.f32.mrf.mxu1 }
 0x38d   :  { %953 = vrot.lane.b32.xlu1 %v392_v6, %s1771_s29 }
 0x38e   :  { %v1435_v40 = vpop.f32.mrf.mxu0  ;;  %v1440_v7 = vpop.f32.mrf.mxu1 }
 0x390   :  { %v395_v61 = vpop.f32.mrf.mxu1  ;;  %v484_v41 = vpop.f32.mrf.mxu0 }
 0x391   :  { %955 = vrot.lane.b32.xlu0 %v395_v61, %s1771_s29  ;;  %961 = vrot.lane.b32.xlu1 %v484_v41, %s1772_s30 }
 0x392   :  { %v1441_v57 = vpop.f32.mrf.mxu1  ;;  %v1446_v13 = vpop.f32.mrf.mxu0 }
 0x394   :  { %v487_v9 = vpop.f32.mrf.mxu0  ;;  %v576_v10 = vpop.f32.mrf.mxu1 }
 0x395   :  { %969 = vrot.lane.b32.xlu1 %v576_v10, %s1773_s8  ;;  %963 = vrot.lane.b32.xlu0 %v487_v9, %s1772_s30 }
 0x396   :  { %v1447_v14 = vpop.f32.mrf.mxu0  ;;  %v1452_v47 = vpop.f32.mrf.mxu1 }
 0x398   :  { %v579_v18 = vpop.f32.mrf.mxu1  ;;  %v668_v53 = vpop.f32.mrf.mxu0 }
 0x399   :  { %971 = vrot.lane.b32.xlu0 %v579_v18, %s1773_s8  ;;  %977 = vrot.lane.b32.xlu1 %v668_v53, %s1774_s9 }
 0x39a   :  { %v1453_v20 = vpop.f32.mrf.mxu1  ;;  %v1458_v22 = vpop.f32.mrf.mxu0 }
 0x39c   :  { %v671_v1 = vpop.f32.mrf.mxu0 }
 0x39d   :  { %v760_v23 = vpop.f32.mrf.mxu1  ;;  %979 = vrot.lane.b32.xlu0 %v671_v1, %s1774_s9  ;;  %s1336_s9 = sshll.u32 %s1779_s5, 4  ;;  %s1337_s9 = int_to_ptr.vmem [resolvable:$true] %s1336_s9 }
 0x39e   :  { %985 = vrot.lane.b32.xlu1 %v760_v23, %s1775_s10  ;;  %v1459_v28 = vpop.f32.mrf.mxu0  ;;  %p1725_p7 = scmp.lt.s32.totalorder %s1337_s9, %s1337_s9 }
 0x39f   :  { %v1464_v31 = vpop.f32.mrf.mxu1 }
 0x3a1   :  { %v763_v55 = vpop.f32.mrf.mxu1  ;;  %v852_v33 = vpop.f32.mrf.mxu0 }
 0x3a2   :  { %987 = vrot.lane.b32.xlu0 %v763_v55, %s1775_s10  ;;  %993 = vrot.lane.b32.xlu1 %v852_v33, %s1776_s11  ;;  %s1720_s10 = scalar_lea.vmem %s1337_s9, 256 }
 0x3a3   :  { %v1465_v15 = vpop.f32.mrf.mxu1  ;;  %v1470_v34 = vpop.f32.mrf.mxu0  ;;  %p1721_p6 = scmp.ne.s32.totalorder %s1337_s9, %s1720_s10  ;;  %p1726_p8 = scmp.lt.s32.totalorder %s1720_s10, %s1720_s10 }
 0x3a5   :  { %v855_v12 = vpop.f32.mrf.mxu0  ;;  %p1727_p9 = por %p1726_p8, %p1725_p7 }
 0x3a6   :  { %v944_v60 = vpop.f32.mrf.mxu1  ;;  %995 = vrot.lane.b32.xlu0 %v855_v12, %s1776_s11 }
 0x3a7   :  { %1001 = vrot.lane.b32.xlu1 %v944_v60, %s1777_s14  ;;  %v1471_v35 = vpop.f32.mrf.mxu0  ;;  %p1728_p10 = pnand %p1727_p9, %p1721_p6 }
 0x3a8   :  { %v1476_v37 = vpop.f32.mrf.mxu1 }
 0x3aa   :  { %v947_v42 = vpop.f32.mrf.mxu1 }
 0x3ab   :  { %1003 = vrot.lane.b32.xlu0 %v947_v42, %s1777_s14 }
 0x3ac   :  { %v1477_v30 = vpop.f32.mrf.mxu1 }
 0x3ca   :  { %1166 = vxpose.xlu1.c.b16.start [1/4] (short) (narrow) %v1556_v38, 16 }
 0x3ce   :  { %1167 = vxpose.xlu1.c.b16.cont [2/4] (short) (narrow) %v1557_v48, 16 }
 0x3d2   :  { %1168 = vxpose.xlu1.c.b16.cont [3/4] (short) (narrow) %v1558_v51, 16 }
 0x3d6   :  { %1169 = vxpose.xlu1.c.b16.end [4/4] (short) (narrow) %v1559_v29, 16 }
 0x3ff   :  { %v954_v56 = vpop.permute.xlu1 %953 }
 0x400   :  { %v1008_v62 = vsel %vm1007_vm6, %v2113_v43, %v954_v56 }
 0x403   :  { %v956_v21 = vpop.permute.xlu0 %955  ;;  %v962_v49 = vpop.permute.xlu1 %961 }
 0x404   :  { %v1010_v63 = vsel %vm237_vm4, %v1008_v62, %v962_v49  ;;  %v1009_v6 = vsel %vm1007_vm6, %v2115_v5, %v956_v21 }
 0x407   :  { %v970_v2 = vpop.permute.xlu1 %969  ;;  %v964_v58 = vpop.permute.xlu0 %963 }
 0x408   :  { %v1013_v3 = vsel %vm1012_vm7, %v1010_v63, %v970_v2  ;;  %v1011_v61 = vsel %vm237_vm4, %v1009_v6, %v964_v58 }
 0x40b   :  { %v972_v16 = vpop.permute.xlu0 %971  ;;  %v978_v59 = vpop.permute.xlu1 %977 }
 0x40c   :  { %v1015_v50 = vsel %vm104_vm1, %v1013_v3, %v978_v59  ;;  %v1014_v43 = vsel %vm1012_vm7, %v1011_v61, %v972_v16 }
 0x40f   :  { %v980_v24 = vpop.permute.xlu0 %979 }
 0x410   :  { %v986_v32 = vpop.permute.xlu1 %985  ;;  %v1016_v9 = vsel %vm104_vm1, %v1014_v43, %v980_v24 }
 0x411   :  { %v1018_v40 = vsel %vm1017_vm8, %v1015_v50, %v986_v32 }
 0x414   :  { %v988_v52 = vpop.permute.xlu0 %987  ;;  %v994_v54 = vpop.permute.xlu1 %993 }
 0x415   :  { %v1021_v41 = vsel %vm1020_vm9, %v1018_v40, %v994_v54  ;;  %v1019_v14 = vsel %vm1017_vm8, %v1016_v9, %v988_v52 }
 0x418   :  { %v996_v7 = vpop.permute.xlu0 %995 }
 0x419   :  { %v1002_v57 = vpop.permute.xlu1 %1001  ;;  %v1022_v47 = vsel %vm1020_vm9, %v1019_v14, %v996_v7 }
 0x41a   :  { %v1024_v13 = vsel %vm1023_vm10, %v1021_v41, %v1002_v57 }
 0x41b   :  { %v1028_v10 = vmin.f32 %v1024_v13, 0.0  ;;  %vm1026_vm11 = vcmp.gt.f32.partialorder %v1024_v13, 0.0 }
 0x41d   :  { %v1030_v18 = vmul.f32 1.442695, %v1028_v10  ;;  %v1004_v53 = vpop.permute.xlu0 %1003 }
 0x41e   :  { %v1025_v20 = vsel %vm1023_vm10, %v1022_v47, %v1004_v53 }
 0x41f   :  { %1624 = vpow2.f32 %v1030_v18  ;;  %v1029_v22 = vmin.f32 %v1025_v20, 0.0  ;;  %vm1027_vm12 = vcmp.gt.f32.partialorder %v1025_v20, 0.0 }
 0x421   :  { %v1032_v5 = vmul.f32 1.442695, %v1029_v22 }
 0x423   :  { %1626 = vpow2.f32 %v1032_v5 }
 0x42c   :  { %v1625_v1 = vpop.eup %1624  ;;  %v1174_v12 = vpop.trf.xlu1 }
 0x42d   :  { %v1365_v23 = vadd.f32 -1.0, %v1625_v1 }
 0x42f   :  { %v1036_v55 = vsel %vm1026_vm11, %v1024_v13, %v1365_v23 }
 0x430   :  { %v1627_v28 = vpop.eup %1626 }
 0x431   :  { %v1366_v31 = vadd.f32 -1.0, %v1627_v28 }
 0x433   :  { %v1037_v33 = vsel %vm1027_vm12, %v1025_v20, %v1366_v31 }
 0x434   :  { %v1038_v15 = vpack.c.bf16 %v1037_v33, %v1036_v55 }
 0x436   :  { %1375 = vmatmul.mubr.msk.bf16.vlgmr.msra.gmra.mxu0 %vm1087_vm13, %v1038_v15  ;;  %v1089_v34 = vsel %vm1087_vm13, %v1038_v15, 0 }
 0x437   :  { %1479 = vmatpush3.bf16.xpose.msra.mxu1 %v1089_v34 }
 0x438   :  { %1484 = vmatprep.subr.bf16.mxu1 %v1754_v0 }
 0x43e   :  { %1481 = vmatmul.mubr.msk.bf16.vlgmr.msra.gmra.mxu1 %vm1087_vm13, %v1174_v12 }
 0x43f   :  { %1486 = vmatprep.mubr.msk.bf16.mxu1 %vm1755_vm0, %v1754_v0 }
 0x4f6   :  { %v1125_v60 = vpop.f32.mrf.mxu0 }
 0x4f8   :  { %v1127_v19 = vpop.f32.mrf.mxu0 }
 0x4f9   :  { %1227 = vperm.xlu0 %1538, %v1127_v19  }
 0x4fa   :  { %v1129_v35 = vpop.f32.mrf.mxu0 }
 0x4fb   :  { %v1272_v36 = vpack.c.bf16 %v1129_v35, %v1125_v60 }
 0x4fc   :  { %v1131_v37 = vpop.f32.mrf.mxu0 }
 0x4fd   :  { %1485 = vmatpush3.bf16.msra.mxu1 %v1272_v36  ;;  %1232 = vperm.xlu0 %1538, %v1131_v37  }
 0x4fe   :  { %v1219_v42 = vpop.f32.mrf.mxu1 }
 0x4ff   :  { %v1238_v17 = vrot.slane %v1219_v42, %v221_v27 }
 0x500   :  { %v1482_v44 = vpop.f32.mrf.mxu1 }
 0x502   :  { %v1222_v26 = vpop.f32.mrf.mxu1 }
 0x504   :  { %v1483_v30 = vpop.f32.mrf.mxu1 }
 0x574   :  { %v1228_v45 = vpop.permute.xlu0 %1227 }
 0x575   :  { %v1239_v11 = vadd.f32 %v1238_v17, %v1228_v45 }
 0x577   :  { %vm1241_vm1 = vcmp.gt.f32.partialorder %v1239_v11, 0.0  ;;  %v1243_v46 = vmul.f32 0.2, %v1239_v11 }
 0x578   :  { %v1233_v0 = vpop.permute.xlu0 %1232 }
 0x579   :  { %v1240_v8 = vadd.f32 %v1238_v17, %v1233_v0  ;;  %v1245_v38 = vsel %vm1241_vm1, %v1239_v11, %v1243_v46 }
 0x57a   :  { %v1247_v48 = vadd.f32 %v1882_v39, %v1245_v38 }
 0x57b   :  { %vm1242_vm0 = vcmp.gt.f32.partialorder %v1240_v8, 0.0  ;;  %v1244_v51 = vmul.f32 0.2, %v1240_v8 }
 0x57c   :  { %v1249_v29 = vsel %vm237_vm4, %v1247_v48, -inf }
 0x57d   :  { %1250 = vmax.xlane.f32.xlu0 %v1249_v29  ;;  %v1246_v56 = vsel %vm1242_vm0, %v1240_v8, %v1244_v51 }
 0x57e   :  { %v1248_v21 = vadd.f32 %v1907_v4, %v1246_v56 }
 0x580   :  { %v1252_v25 = vsel %vm237_vm4, %v1248_v21, -inf }
 0x581   :  { %1253 = vmax.xlane.f32.xlu0 %v1252_v25 }
 0x606   :  { %v1251_v27 = vpop.xlane.xlu0 %1250 }
 0x607   :  { %v1255_v49 = vsub.f32 %v1247_v48, %v1251_v27 }
 0x609   :  { %v1257_v2 = vmul.f32 1.442695, %v1255_v49 }
 0x60a   :  { %v1254_v58 = vpop.xlane.xlu0 %1253 }
 0x60b   :  { %1628 = vpow2.f32 %v1257_v2  ;;  %v1256_v16 = vsub.f32 %v1248_v21, %v1254_v58 }
 0x60d   :  { %v1259_v59 = vmul.f32 1.442695, %v1256_v16 }
 0x60f   :  { %1630 = vpow2.f32 %v1259_v59 }
 0x618   :  { %v1629_v39 = vpop.eup %1628 }
 0x619   :  { %v1261_v24 = vsel %vm237_vm4, %v1629_v39, 0.0 }
 0x61a   :  { %1262 = vadd.xlane.f32.xlu1 %v1261_v24 }
 0x61c   :  { %v1631_v32 = vpop.eup %1630 }
 0x61d   :  { %v1264_v62 = vsel %vm237_vm4, %v1631_v32, 0.0 }
 0x61e   :  { %1265 = vadd.xlane.f32.xlu0 %v1264_v62 }
 0x6a3   :  { %v1263_v4 = vpop.xlane.xlu1 %1262 }
 0x6a4   :  { %1632 = vrcp.f32 %v1263_v4 }
 0x6a7   :  { %v1266_v52 = vpop.xlane.xlu0 %1265 }
 0x6a8   :  { %1634 = vrcp.f32 %v1266_v52 }
 0x6b1   :  { %v1633_v54 = vpop.eup %1632 }
 0x6b2   :  { %v1269_v3 = vmul.f32 %v1633_v54, %v1629_v39 }
 0x6b5   :  { %v1635_v63 = vpop.eup %1634 }
 0x6b6   :  { %v1270_v50 = vmul.f32 %v1635_v63, %v1631_v32 }
 0x6b8   :  { %v1271_v6 = vpack.c.bf16 %v1270_v50, %v1269_v3 }
 0x6ba   :  { %1487 = vmatmul.mubr.msk.bf16.vlgmr.msra.gmra.mxu1 %vm237_vm4, %v1271_v6 }
 0x77a   :  { %v1310_v40 = vpop.f32.mrf.mxu1 }
 0x77b   :  { %v1319_v7 = vmin.f32 %v1310_v40, 0.0  ;;  %vm1317_vm14 = vcmp.gt.f32.partialorder %v1310_v40, 0.0 }
 0x77c   :  { %v1488_v61 = vpop.f32.mrf.mxu1 }
 0x77d   :  { %v1321_v41 = vmul.f32 1.442695, %v1319_v7 }
 0x77e   :  { %v1313_v57 = vpop.f32.mrf.mxu1 }
 0x77f   :  { %1636 = vpow2.f32 %v1321_v41  ;;  %v1320_v43 = vmin.f32 %v1313_v57, 0.0  ;;  %vm1318_vm4 = vcmp.gt.f32.partialorder %v1313_v57, 0.0 }
 0x780   :  { %v1489_v13 = vpop.f32.mrf.mxu1 }
 0x781   :  { %v1323_v9 = vmul.f32 1.442695, %v1320_v43 }
 0x783   :  { %1638 = vpow2.f32 %v1323_v9 }
 0x78c   :  { %v1637_v10 = vpop.eup %1636 }
 0x78d   :  { %v1382_v14 = vadd.f32 -1.0, %v1637_v10 }
 0x78f   :  { %v1327_v47 = vsel %vm1317_vm14, %v1310_v40, %v1382_v14 }
 0x790   :  { %v1639_v18 = vpop.eup %1638  ;;  %1329 = vst [vmem:[#allocation10] sm:$0xff] %v1327_v47 }
 0x791   :  { %v1383_v53 = vadd.f32 -1.0, %v1639_v18 }
 0x793   :  { %v1328_v20 = vsel %vm1318_vm4, %v1313_v57, %v1383_v53 }
 0x794   :  { %1330 = vst [vmem:[#allocation10 + $0x8] sm:$0xff] %v1328_v20 }
 0x795   :  { %1731 = shalt.err (!%p1728_p10)
}
 0x796   :  { %s1780_s11 = smov 128  }
 0x797   :  { %1342 = dma.vmem_to_hbm [thread:$0]  %s1337_s9, 256, %s2186_s7, [#allocation4], %s1780_s11, %s1780_s11, %s1771_s29  }
 0x798   :  { %1746 = dma.done.wait [#allocation4], 256  }
 0x799   :  { %1747 = vsyncadd [#allocation4], 4294967040 }
 0x79a   :  { %1346 = vsyncpa [#allocation3], 1 }
 0x79b   :  { %1347 = vsyncpa [#allocation6], 1 }
 0x79c   :  { %1348 = vsyncpa [#allocation9], 1 }
 0x79d   :  { %1349 = vsyncpa [#allocation4], 1 }

</bundles_post_ra>
